<compile_context>
chip_gen: v7x
topology: tpu7x:2x2x1
jax: 0.10.0
libtpu: 0.0.40
codegen_flags: <defaults>
</compile_context>

<pallas_src>
import jax
import jax.numpy as jnp
from jax import lax
from jax.experimental import pallas as pl
from jax.experimental.pallas import tpu as pltpu


_LANES = 128


def _round_up(n, m):
    return ((n + m - 1) // m) * m


def linear_kernel(b_ref, x_ref, w_ref, o_ref):
    # b_ref: SMEM (1,)            bias scalar
    # x_ref: VMEM (rt, 896)       rt row-groups of 128 samples, features interleaved
    # w_ref: VMEM (896, 128)      kron(eye(128), w[:,None]) structured weights
    # o_ref: VMEM (rt, 128)       lane-dense outputs: o[r, c] = y[128*r + c]
    o_ref[...] = jnp.dot(
        x_ref[...], w_ref[...],
        preferred_element_type=jnp.float32,
        precision=lax.Precision.HIGHEST,      # true-f32 accuracy on the MXU
    ) + b_ref[0]


def neural_network_forward(x, weight, bias, *, max_row_tile=256):
    """y = x @ W^T + b, same math as PyTorch nn.Linear(7, 1).

    x: (B, 7) f32, weight: (1, 7) f32, bias: (1,) f32 -> (B, 1) f32.
    """
    B, K = x.shape
    assert weight.shape == (1, K) and bias.shape == (1,)

    x = x.astype(jnp.float32)

    # Pad the batch to a multiple of 128 lanes ONLY (decoupled from tile size).
    # When B is already a multiple of 128 this is a no-op and x is never copied
    # before the kernel.
    b_pad = _round_up(max(B, 1), _LANES)
    if b_pad != B:
        x = jnp.pad(x, ((0, b_pad - B), (0, 0)))
    R = b_pad // _LANES                      # number of 128-sample row-groups

    # Free (bitcast) reshape: (b_pad, 7) -> (R, 896). Row r holds samples
    # [128r, 128r+128) with their 7 features interleaved along the lane axis.
    x896 = x.reshape(R, _LANES * K)

    # Structured weight: W_big[7*i + k, j] = w[k] * (i == j), so x896 @ W_big
    # computes the per-sample 7-wide dot product with the batch landing on the
    # lane axis (lane-dense output tiles).
    w1d = weight.reshape(K).astype(jnp.float32)
    w_big = jnp.kron(jnp.eye(_LANES, dtype=jnp.float32), w1d[:, None])  # (896, 128)
    b1d = bias.astype(jnp.float32)

    # Row tile: up to 256 row-groups (= 32768 samples) per grid step, multiple
    # of 8 sublanes, but keep >= 2 grid steps whenever possible so the
    # "parallel" axis can be sharded across v7x's two TensorCores.
    if R <= 8:
        rt = R
    else:
        rt = min(max_row_tile, _round_up((R + 1) // 2, 8))
    num_tiles = pl.cdiv(R, rt)               # ragged last tile masked by Pallas

    out = pl.pallas_call(
        linear_kernel,
        out_shape=jax.ShapeDtypeStruct((R, _LANES), jnp.float32),
        grid=(num_tiles,),
        in_specs=[
            pl.BlockSpec(memory_space=pltpu.MemorySpace.SMEM),      # bias (1,)
            pl.BlockSpec((rt, _LANES * K), lambda i: (i, 0)),       # x row tile
            pl.BlockSpec((_LANES * K, _LANES), lambda i: (0, 0)),   # W_big (fetched once)
        ],
        out_specs=pl.BlockSpec((rt, _LANES), lambda i: (i, 0)),     # lane-dense out
        compiler_params=pltpu.CompilerParams(
            dimension_semantics=("parallel",)),
        cost_estimate=pl.CostEstimate(
            flops=2 * R * (_LANES * K) * _LANES,
            bytes_accessed=(b_pad * K + (_LANES * K) * _LANES + b_pad + K + 1) * 4,
            transcendentals=0),
    )(b1d, x896, w_big)

    # (R, 128) is y in row-major order already; reshape/slice back to (B, 1).
    return out.reshape(b_pad)[:B].reshape(B, 1)


def _reference(x, weight, bias):
    # Pure-VPU f32 reference (no MXU precision ambiguity).
    return (x * weight.reshape(1, -1)).sum(axis=-1, keepdims=True) + bias


if __name__ == "__main__":
    key = jax.random.PRNGKey(0)
    kx, kw, kb, kx2, kx3 = jax.random.split(key, 5)

    # Deterministic synthetic parameters (shapes from nn.Linear(7, 1)).
    weight = jax.random.normal(kw, (1, 7), dtype=jnp.float32) * 0.1
    bias = jax.random.normal(kb, (1,), dtype=jnp.float32) * 0.1

    # Small batch (exercises the padded, single-tile path).
    x = jax.random.normal(kx, (8, 7), dtype=jnp.float32)
    out = jax.block_until_ready(neural_network_forward(x, weight, bias))
    ref = _reference(x, weight, bias)
    assert out.shape == (8, 1)
    assert jnp.allclose(out, ref, atol=1e-5, rtol=1e-5)

    # Ragged (non-multiple-of-128) batch.
    x2 = jax.random.normal(kx2, (300, 7), dtype=jnp.float32)
    out2 = jax.block_until_ready(neural_network_forward(x2, weight, bias))
    ref2 = _reference(x2, weight, bias)
    assert out2.shape == (300, 1)
    assert jnp.allclose(out2, ref2, atol=1e-5, rtol=1e-5)

    # 128-aligned batch: no padding, multi-step grid, W_big block reuse.
    x3 = jax.random.normal(kx3, (4096, 7), dtype=jnp.float32)
    out3 = jax.block_until_ready(neural_network_forward(x3, weight, bias))
    ref3 = _reference(x3, weight, bias)
    assert out3.shape == (4096, 1)
    assert jnp.allclose(out3, ref3, atol=1e-5, rtol=1e-5)

    print("KERNEL_OK")
</pallas_src>

<mosaic_0001>
module attributes {stable_mosaic.version = 11 : i64} {
  func.func @linear_kernel(%arg0: i32, %arg1: memref<1xf32, #tpu.memory_space<smem>>, %arg2: memref<1x896xf32, #tpu.memory_space<vmem>>, %arg3: memref<896x128xf32, #tpu.memory_space<vmem>>, %arg4: memref<1x128xf32, #tpu.memory_space<vmem>>) attributes {dimension_semantics = [#tpu.dimension_semantics<parallel>], iteration_bounds = array<i64: 1>, scalar_prefetch = 0 : i64, scratch_operands = 0 : i64, tpu.core_type = #tpu.core_type<tc>, window_params = [{transform_indices = @transform_0, window_bounds = array<i64: 1>}, {transform_indices = @transform_1, window_bounds = array<i64: 1, 896>}, {pipeline_mode = #tpu.pipeline_mode<synchronous>, transform_indices = @transform_2, window_bounds = array<i64: 896, 128>}, {transform_indices = @transform_3, window_bounds = array<i64: 1, 128>}]} {
    %c0 = arith.constant 0 : index
    %c0_0 = arith.constant 0 : index
    %0 = vector.load %arg2[%c0, %c0_0] : memref<1x896xf32, #tpu.memory_space<vmem>>, vector<1x896xf32>
    %c0_1 = arith.constant 0 : index
    %c0_2 = arith.constant 0 : index
    %1 = vector.load %arg3[%c0_1, %c0_2] : memref<896x128xf32, #tpu.memory_space<vmem>>, vector<896x128xf32>
    %cst = arith.constant dense<0.000000e+00> : vector<1x128xf32>
    %2 = tpu.matmul %0, %1, %cst {dimension_numbers = #tpu.dot_dimension_numbers<[1], [0], [0], [1], [0, 0, 1, 1], [], []>, precision = #tpu.contract_precision<fp32>} : vector<1x896xf32>, vector<896x128xf32>, vector<1x128xf32> -> vector<1x128xf32>
    %c0_3 = arith.constant 0 : index
    %3 = memref.load %arg1[%c0_3] : memref<1xf32, #tpu.memory_space<smem>>
    %4 = vector.broadcast %3 : f32 to vector<1x128xf32>
    %5 = arith.addf %2, %4 : vector<1x128xf32>
    %c0_4 = arith.constant 0 : index
    %c0_5 = arith.constant 0 : index
    %6 = vector.load %arg4[%c0_4, %c0_5] : memref<1x128xf32, #tpu.memory_space<vmem>>, vector<1x128xf32>
    tpu.vector_store %arg4[%c0_4, %c0_5], %5 {strides = array<i32>} : memref<1x128xf32, #tpu.memory_space<vmem>>, vector<1x128xf32>,
    return
  }
  func.func @transform_0(%arg0: i32) -> i32 {
    %c0_i32 = arith.constant 0 : i32
    %c0_i32_0 = arith.constant 0 : i32
    return %c0_i32 : i32
  }
  func.func @transform_1(%arg0: i32) -> (i32, i32) {
    %c0_i32 = arith.constant 0 : i32
    %c0_i32_0 = arith.constant 0 : i32
    return %arg0, %c0_i32 : i32, i32
  }
  func.func @transform_2(%arg0: i32) -> (i32, i32) {
    %c0_i32 = arith.constant 0 : i32
    %c0_i32_0 = arith.constant 0 : i32
    %c0_i32_1 = arith.constant 0 : i32
    return %c0_i32, %c0_i32_0 : i32, i32
  }
  func.func @transform_3(%arg0: i32) -> (i32, i32) {
    %c0_i32 = arith.constant 0 : i32
    %c0_i32_0 = arith.constant 0 : i32
    return %arg0, %c0_i32 : i32, i32
  }
}

</mosaic_0001>

<bundles_post_ra>
// kernel: tpu_custom_call.1
= control target key start
LH: loop header
LB: loop body
LE: loop exit
PB: predicated region body
PF: predicated region fallthrough
CT: control target
= control target key end

     0   :  { %9 = vsyncpa [#allocation4], 0  ;;  %s7124_s0 = inlined_call_operand.<no memory space> [shape: f32[1], index: 0, kind: input, shape index: {}]   ;;  %s7125_s1 = inlined_call_operand.hbm [shape: f32[1,896], index: 1, kind: input, shape index: {}]   ;;  %s7126_s2 = inlined_call_operand.hbm [shape: f32[896,128], index: 2, kind: input, shape index: {}]   ;;  %s7127_s3 = inlined_call_operand.hbm [shape: f32[1,128], index: 3, kind: output, shape index: {}]  }
   0x1   :  { %10 = vsyncpa [#allocation7], 0 }
   0x2   :  { %11 = vsyncpa [#allocation5], 0  ;;  %s5191_s12 = smov [#allocation3]   ;;  %s5192_s14 = smov [#allocation6]  }
   0x3   :  { %s20_s13 = sshll.u32 %s5191_s12, 4  ;;  %s29_s15 = sshll.u32 %s5192_s14, 4  ;;  %s21_s13 = int_to_ptr.vmem [resolvable:$true] %s20_s13  ;;  %s5219_s15 = int_to_ptr.vmem [resolvable:$true] %s29_s15 }
   0x4   :  { %s5119_s18 = scalar_lea.hbm %s7125_s1, 112 }
   0x5   :  { %p5120_p0 = scmp.ne.s32.totalorder %s7125_s1, %s5119_s18  ;;  %p5123_p1 = scmp.lt.u32.totalorder %s5119_s18, %s7125_s1 }
   0x7   :  { %p5125_p2 = pnand %p5123_p1, %p5120_p0 }
   0x9   :  { %5128 = shalt.err (!%p5125_p2)
}
   0xa   :  { %s5129_s23 = scalar_lea.vmem %s21_s13, 112  ;;  %s5133_s24 = scalar_lea.vmem %s21_s13, 128 }
   0xb   :  { %p5130_p3 = scmp.ne.s32.totalorder %s21_s13, %s5129_s23  ;;  %p5134_p4 = scmp.lt.s32.totalorder %s21_s13, %s21_s13 }
   0xc   :  { %p5135_p5 = scmp.lt.s32.totalorder %s5133_s24, %s5129_s23 }
   0xe   :  { %p5136_p6 = por %p5135_p5, %p5134_p4 }
  0x10   :  { %p5137_p7 = pnand %p5136_p6, %p5130_p3 }
  0x12   :  { %5140 = shalt.err (!%p5137_p7)
}
  0x13   :  { %23 = dma.hbm_to_vmem [thread:$0]  %s7125_s1, 112, %s21_s13, [#allocation4]  }
  0x14   :  { %s5141_s29 = scalar_lea.hbm %s7126_s2, 14336 }
  0x15   :  { %p5142_p8 = scmp.ne.s32.totalorder %s7126_s2, %s5141_s29  ;;  %p5145_p9 = scmp.lt.u32.totalorder %s5141_s29, %s7126_s2 }
  0x17   :  { %p5147_p10 = pnand %p5145_p9, %p5142_p8 }
  0x19   :  { %5150 = shalt.err (!%p5147_p10)
}
  0x1a   :  { %s5151_s7 = scalar_lea.vmem %s5219_s15, 14336  ;;  %p5156_p12 = scmp.lt.s32.totalorder %s5219_s15, %s5219_s15 }
  0x1b   :  { %p5152_p11 = scmp.ne.s32.totalorder %s5219_s15, %s5151_s7  ;;  %p5157_p13 = scmp.lt.s32.totalorder %s5151_s7, %s5151_s7 }
  0x1d   :  { %p5158_p0 = por %p5157_p13, %p5156_p12 }
  0x1f   :  { %p5159_p1 = pnand %p5158_p0, %p5152_p11 }
  0x21   :  { %5162 = shalt.err (!%p5159_p1)
}
  0x22   :  { %s5193_s1 = smov 128   ;;  %s5194_s8 = smov 8  }
  0x23   :  { %35 = dma.hbm_to_vmem [thread:$0]  %s7126_s2, 14336, %s5219_s15, [#allocation7], %s5193_s1, %s5193_s1, %s5194_s8  }
  0x24   :  { %5185 = dma.done.wait [#allocation4], 112  }
  0x25   :  { %5186 = vsyncadd [#allocation4], 4294967184 }
  0x26   :  { %5187 = dma.done.wait [#allocation7], 14336  }
  0x27   :  { %5188 = vsyncadd [#allocation7], 4294952960  ;;  %v158_v0 = vlaneseq  ;;  %v59_v2 = vld [vmem:[#allocation6 + $0x80] sm:$0xff]  ;;  %v60_v3 = vld [vmem:[#allocation6 + $0x88] sm:$0xff]  ;;  %vm5196_vm0 = vmmov 0  }
  0x28   :  { %v91_v4 = vld [vmem:[#allocation6 + $0x180] sm:$0xff]  ;;  %v242_v5 = vand.u32 4294901760, %v59_v2  ;;  %v245_v6 = vand.u32 4294901760, %v60_v3  ;;  %v92_v7 = vld [vmem:[#allocation6 + $0x188] sm:$0xff]  ;;  %v61_v16 = vld [vmem:[#allocation6 + $0x90] sm:$0xff] }
  0x29   :  { %v5250_v1 = vshrl.u32 %v158_v0, 7  ;;  %v1104_v8 = vand.u32 4294901760, %v91_v4  ;;  %v43_v9 = vld [vmem:[#allocation6] sm:$0xff]  ;;  %v44_v10 = vld [vmem:[#allocation6 + $0x8] sm:$0xff]  ;;  %v1107_v11 = vand.u32 4294901760, %v92_v7  ;;  %v62_v18 = vld [vmem:[#allocation6 + $0x98] sm:$0xff] }
  0x2a   :  { %v194_v12 = vand.u32 4294901760, %v43_v9  ;;  %v197_v13 = vand.u32 4294901760, %v44_v10  ;;  %v75_v14 = vld [vmem:[#allocation6 + $0x100] sm:$0xff]  ;;  %v76_v15 = vld [vmem:[#allocation6 + $0x108] sm:$0xff]  ;;  %v5252_v17 = vpack.c.bf16 %v245_v6, %v242_v5  ;;  %v93_v19 = vld [vmem:[#allocation6 + $0x190] sm:$0xff]  ;;  %v5257_v24 = vsub.f32 %v59_v2, %v242_v5 }
  0x2b   :  { %7445 = vst [vmem:[#allocation12_spill] sm:$0xff] %v5250_v1  ;;  %v94_v20 = vld [vmem:[#allocation6 + $0x198] sm:$0xff]  ;;  %v5259_v25 = vpack.c.bf16 %v1107_v11, %v1104_v8  ;;  %v45_v27 = vld [vmem:[#allocation6 + $0x10] sm:$0xff]  ;;  %v5265_v29 = vsub.f32 %v60_v3, %v245_v6  ;;  %v1056_v30 = vand.u32 4294901760, %v75_v14  ;;  %v1059_v31 = vand.u32 4294901760, %v76_v15  ;;  %v63_v44 = vld [vmem:[#allocation6 + $0xa0] sm:$0xff] }
  0x2c   :  { %7446 = vst [vmem:[#allocation13_spill] sm:$0xff] %v5252_v17  ;;  %7447 = vst [vmem:[#allocation14_spill] sm:$0xff] %v5257_v24  ;;  %v5261_v26 = vpack.c.bf16 %v197_v13, %v194_v12  ;;  %4380 = vmatprep.subr.bf16.mxu1 %v5252_v17  ;;  %v248_v32 = vand.u32 4294901760, %v61_v16  ;;  %v5268_v33 = vsub.f32 %v91_v4, %v1104_v8  ;;  %v251_v34 = vand.u32 4294901760, %v62_v18  ;;  %v46_v37 = vld [vmem:[#allocation6 + $0x18] sm:$0xff]  ;;  %v77_v38 = vld [vmem:[#allocation6 + $0x110] sm:$0xff] }
  0x2d   :  { %7448 = vst [vmem:[#allocation15_spill] sm:$0xff] %v5259_v25  ;;  %7450 = vst [vmem:[#allocation17_spill] sm:$0xff] %v5265_v29  ;;  %4572 = vmatprep.subr.bf16.mxu0 %v5259_v25  ;;  %v1110_v35 = vand.u32 4294901760, %v93_v19  ;;  %v1113_v36 = vand.u32 4294901760, %v94_v20  ;;  %v78_v39 = vld [vmem:[#allocation6 + $0x118] sm:$0xff]  ;;  %v5271_v40 = vsub.f32 %v92_v7, %v1107_v11  ;;  %v5273_v41 = vsub.f32 %v43_v9, %v194_v12  ;;  %v64_v45 = vld [vmem:[#allocation6 + $0xa8] sm:$0xff] }
  0x2e   :  { %7449 = vst [vmem:[#allocation16_spill] sm:$0xff] %v5261_v26  ;;  %4382 = vmatpush3.bf16.msra.mxu1 %v5261_v26  ;;  %v5275_v42 = vpack.c.bf16 %v1059_v31, %v1056_v30  ;;  %v200_v43 = vand.u32 4294901760, %v45_v27  ;;  %v95_v46 = vld [vmem:[#allocation6 + $0x1a0] sm:$0xff]  ;;  %v5277_v47 = vsub.f32 %v44_v10, %v197_v13  ;;  %v5279_v48 = vsub.f32 %v75_v14, %v1056_v30  ;;  %v96_v51 = vld [vmem:[#allocation6 + $0x1a8] sm:$0xff]  ;;  %v65_v5 = vld [vmem:[#allocation6 + $0xb0] sm:$0xff] }
  0x2f   :  { %7451 = vst [vmem:[#allocation18_spill] sm:$0xff] %v5273_v41  ;;  %v5281_v49 = vpack.c.bf16 %v251_v34, %v248_v32  ;;  %v5283_v50 = vpack.c.bf16 %v1113_v36, %v1110_v35  ;;  %v5286_v52 = vsub.f32 %v76_v15, %v1059_v31  ;;  %v5288_v53 = vsub.f32 %v61_v16, %v248_v32  ;;  %v47_v60 = vld [vmem:[#allocation6 + $0x20] sm:$0xff]  ;;  %v48_v61 = vld [vmem:[#allocation6 + $0x28] sm:$0xff]  ;;  %v66_v10 = vld [vmem:[#allocation6 + $0xb8] sm:$0xff] }
  0x30   :  { %7452 = vst [vmem:[#allocation19_spill] sm:$0xff] %v5275_v42  ;;  %7453 = vst [vmem:[#allocation20_spill] sm:$0xff] %v5277_v47  ;;  %4574 = vmatpush3.bf16.msra.mxu0 %v5275_v42  ;;  %v203_v54 = vand.u32 4294901760, %v46_v37  ;;  %v1062_v55 = vand.u32 4294901760, %v77_v38  ;;  %v1065_v56 = vand.u32 4294901760, %v78_v39  ;;  %v254_v57 = vand.u32 4294901760, %v63_v44 }
  0x31   :  { %7454 = vst [vmem:[#allocation21_spill] sm:$0xff] %v5281_v49  ;;  %7455 = vst [vmem:[#allocation22_spill] sm:$0xff] %v5283_v50  ;;  %4384 = vmatprep.subr.bf16.mxu1 %v5281_v49  ;;  %4576 = vmatprep.subr.bf16.mxu0 %v5283_v50  ;;  %v257_v58 = vand.u32 4294901760, %v64_v45  ;;  %v1116_v59 = vand.u32 4294901760, %v95_v46  ;;  %v5292_v62 = vsub.f32 %v62_v18, %v251_v34  ;;  %v1119_v2 = vand.u32 4294901760, %v96_v51  ;;  %v79_v3 = vld [vmem:[#allocation6 + $0x120] sm:$0xff] }
  0x32   :  { %7456 = vst [vmem:[#allocation23_spill] sm:$0xff] %v5288_v53  ;;  %v5294_v63 = vsub.f32 %v93_v19, %v1110_v35  ;;  %v5296_v0 = vpack.c.bf16 %v203_v54, %v200_v43  ;;  %v80_v4 = vld [vmem:[#allocation6 + $0x128] sm:$0xff]  ;;  %v5298_v6 = vsub.f32 %v94_v20, %v1113_v36  ;;  %v5300_v7 = vsub.f32 %v45_v27, %v200_v43  ;;  %v97_v11 = vld [vmem:[#allocation6 + $0x1b0] sm:$0xff]  ;;  %v98_v12 = vld [vmem:[#allocation6 + $0x1b8] sm:$0xff] }
  0x33   :  { %7457 = vst [vmem:[#allocation24_spill] sm:$0xff] %v5292_v62  ;;  %v5302_v8 = vpack.c.bf16 %v1065_v56, %v1062_v55  ;;  %v5304_v9 = vpack.c.bf16 %v257_v58, %v254_v57  ;;  %v5307_v13 = vsub.f32 %v46_v37, %v203_v54  ;;  %v5309_v14 = vsub.f32 %v77_v38, %v1062_v55  ;;  %v49_v35 = vld [vmem:[#allocation6 + $0x30] sm:$0xff]  ;;  %v50_v43 = vld [vmem:[#allocation6 + $0x38] sm:$0xff]  ;;  %v67_v21 = vld [vmem:[#allocation6 + $0xc0] sm:$0xff] }
  0x34   :  { %7458 = vst [vmem:[#allocation25_spill] sm:$0xff] %v5296_v0  ;;  %4386 = vmatpush3.bf16.msra.mxu1 %v5296_v0  ;;  %v5311_v15 = vsub.f32 %v78_v39, %v1065_v56  ;;  %v5313_v16 = vpack.c.bf16 %v1119_v2, %v1116_v59  ;;  %v206_v18 = vand.u32 4294901760, %v47_v60  ;;  %v209_v19 = vand.u32 4294901760, %v48_v61  ;;  %v81_v54 = vld [vmem:[#allocation6 + $0x130] sm:$0xff]  ;;  %v82_v55 = vld [vmem:[#allocation6 + $0x138] sm:$0xff]  ;;  %v83_v50 = vld [vmem:[#allocation6 + $0x140] sm:$0xff] }
  0x35   :  { %7459 = vst [vmem:[#allocation26_spill] sm:$0xff] %v5302_v8  ;;  %7460 = vst [vmem:[#allocation27_spill] sm:$0xff] %v5304_v9  ;;  %4578 = vmatpush3.bf16.msra.mxu0 %v5302_v8  ;;  %4388 = vmatprep.subr.bf16.mxu1 %v5304_v9  ;;  %v1068_v20 = vand.u32 4294901760, %v79_v3  ;;  %v1071_v27 = vand.u32 4294901760, %v80_v4  ;;  %v260_v30 = vand.u32 4294901760, %v65_v5  ;;  %v263_v31 = vand.u32 4294901760, %v66_v10 }
  0x36   :  { %7461 = vst [vmem:[#allocation28_spill] sm:$0xff] %v5313_v16  ;;  %4580 = vmatprep.subr.bf16.mxu0 %v5313_v16  ;;  %v1122_v32 = vand.u32 4294901760, %v97_v11  ;;  %v1125_v34 = vand.u32 4294901760, %v98_v12  ;;  %v5318_v36 = vsub.f32 %v63_v44, %v254_v57  ;;  %v5320_v37 = vsub.f32 %v64_v45, %v257_v58  ;;  %v68_v44 = vld [vmem:[#allocation6 + $0xc8] sm:$0xff]  ;;  %v85_v17 = vld [vmem:[#allocation6 + $0x150] sm:$0xff] }
  0x37   :  { %v5322_v38 = vpack.c.bf16 %v209_v19, %v206_v18  ;;  %v5324_v39 = vpack.c.bf16 %v1071_v27, %v1068_v20  ;;  %v5326_v56 = vsub.f32 %v95_v46, %v1116_v59  ;;  %v5328_v28 = vsub.f32 %v96_v51, %v1119_v2  ;;  %v99_v59 = vld [vmem:[#allocation6 + $0x1c0] sm:$0xff]  ;;  %v100_v16 = vld [vmem:[#allocation6 + $0x1c8] sm:$0xff] }
  0x38   :  { %v5330_v23 = vsub.f32 %v47_v60, %v206_v18  ;;  %v5332_v22 = vpack.c.bf16 %v263_v31, %v260_v30  ;;  %v5335_v45 = vsub.f32 %v48_v61, %v209_v19  ;;  %v5338_v57 = vsub.f32 %v79_v3, %v1068_v20  ;;  %v51_v20 = vld [vmem:[#allocation6 + $0x40] sm:$0xff] }
  0x39   :  { %7462 = vst [vmem:[#allocation29_spill] sm:$0xff] %v5322_v38  ;;  %7463 = vst [vmem:[#allocation30_spill] sm:$0xff] %v5324_v39  ;;  %4390 = vmatpush3.bf16.msra.mxu1 %v5322_v38  ;;  %4582 = vmatpush3.bf16.msra.mxu0 %v5324_v39  ;;  %v5340_v58 = vpack.c.bf16 %v1125_v34, %v1122_v32  ;;  %v212_v46 = vand.u32 4294901760, %v49_v35  ;;  %v5342_v51 = vsub.f32 %v80_v4, %v1071_v27  ;;  %v52_v39 = vld [vmem:[#allocation6 + $0x48] sm:$0xff]  ;;  %v69_v38 = vld [vmem:[#allocation6 + $0xd0] sm:$0xff] }
  0x3a   :  { %7464 = vst [vmem:[#allocation31_spill] sm:$0xff] %v5326_v56  ;;  %7465 = vst [vmem:[#allocation32_spill] sm:$0xff] %v5328_v28  ;;  %4392 = vmatprep.subr.bf16.mxu1 %v5332_v22  ;;  %v215_v60 = vand.u32 4294901760, %v50_v43  ;;  %v1074_v2 = vand.u32 4294901760, %v81_v54  ;;  %v1077_v18 = vand.u32 4294901760, %v82_v55  ;;  %v5345_v8 = vsub.f32 %v65_v5, %v260_v30  ;;  %v70_v5 = vld [vmem:[#allocation6 + $0xd8] sm:$0xff] }
  0x3b   :  { %7466 = vst [vmem:[#allocation33_spill] sm:$0xff] %v5330_v23  ;;  %7467 = vst [vmem:[#allocation34_spill] sm:$0xff] %v5332_v22  ;;  %v5347_v61 = vsub.f32 %v66_v10, %v263_v31  ;;  %4584 = vmatprep.subr.bf16.mxu0 %v5340_v58  ;;  %v266_v3 = vand.u32 4294901760, %v67_v21  ;;  %v269_v19 = vand.u32 4294901760, %v68_v44  ;;  %v5350_v42 = vsub.f32 %v97_v11, %v1122_v32  ;;  %v84_v22 = vld [vmem:[#allocation6 + $0x148] sm:$0xff] }
  0x3c   :  { %7468 = vst [vmem:[#allocation35_spill] sm:$0xff] %v5335_v45  ;;  %7469 = vst [vmem:[#allocation36_spill] sm:$0xff] %v5338_v57  ;;  %v5352_v4 = vpack.c.bf16 %v215_v60, %v212_v46  ;;  %v5354_v27 = vpack.c.bf16 %v1077_v18, %v1074_v2  ;;  %v1128_v25 = vand.u32 4294901760, %v99_v59  ;;  %v5356_v30 = vsub.f32 %v98_v12, %v1125_v34 }
  0x3d   :  { %7470 = vst [vmem:[#allocation37_spill] sm:$0xff] %v5340_v58  ;;  %7471 = vst [vmem:[#allocation38_spill] sm:$0xff] %v5342_v51  ;;  %v5358_v10 = vsub.f32 %v49_v35, %v212_v46  ;;  %v5360_v31 = vsub.f32 %v50_v43, %v215_v60  ;;  %v5362_v58 = vpack.c.bf16 %v269_v19, %v266_v3  ;;  %v1131_v32 = vand.u32 4294901760, %v100_v16  ;;  %v101_v46 = vld [vmem:[#allocation6 + $0x1d0] sm:$0xff]  ;;  %v102_v43 = vld [vmem:[#allocation6 + $0x1d8] sm:$0xff] }
  0x3e   :  { %7472 = vst [vmem:[#allocation39_spill] sm:$0xff] %v5345_v8  ;;  %7473 = vst [vmem:[#allocation40_spill] sm:$0xff] %v5347_v61  ;;  %4394 = vmatpush3.bf16.msra.mxu1 %v5352_v4  ;;  %4586 = vmatpush3.bf16.msra.mxu0 %v5354_v27  ;;  %v5366_v11 = vsub.f32 %v81_v54, %v1074_v2  ;;  %v218_v9 = vand.u32 4294901760, %v51_v20  ;;  %v221_v0 = vand.u32 4294901760, %v52_v39  ;;  %v1080_v49 = vand.u32 4294901760, %v83_v50  ;;  %v53_v54 = vld [vmem:[#allocation6 + $0x50] sm:$0xff] }
  0x3f   :  { %7474 = vst [vmem:[#allocation41_spill] sm:$0xff] %v5350_v42  ;;  %7475 = vst [vmem:[#allocation42_spill] sm:$0xff] %v5352_v4  ;;  %4396 = vmatprep.subr.bf16.mxu1 %v5362_v58  ;;  %v1083_v12 = vand.u32 4294901760, %v84_v22  ;;  %v272_v34 = vand.u32 4294901760, %v69_v38  ;;  %v275_v35 = vand.u32 4294901760, %v70_v5  ;;  %v5369_v60 = vsub.f32 %v82_v55, %v1077_v18  ;;  %v54_v2 = vld [vmem:[#allocation6 + $0x58] sm:$0xff] }
  0x40   :  { %7476 = vst [vmem:[#allocation43_spill] sm:$0xff] %v5354_v27  ;;  %7477 = vst [vmem:[#allocation44_spill] sm:$0xff] %v5356_v30  ;;  %v5371_v26 = vsub.f32 %v67_v21, %v266_v3  ;;  %v5373_v4 = vpack.c.bf16 %v1131_v32, %v1128_v25  ;;  %v5375_v27 = vpack.c.bf16 %v221_v0, %v218_v9  ;;  %v71_v55 = vld [vmem:[#allocation6 + $0xe0] sm:$0xff]  ;;  %v72_v18 = vld [vmem:[#allocation6 + $0xe8] sm:$0xff] }
  0x41   :  { %7478 = vst [vmem:[#allocation45_spill] sm:$0xff] %v5358_v10  ;;  %7479 = vst [vmem:[#allocation46_spill] sm:$0xff] %v5360_v31  ;;  %v5381_v30 = vsub.f32 %v100_v16, %v1131_v32  ;;  %v5383_v42 = vpack.c.bf16 %v1083_v12, %v1080_v49  ;;  %v86_v31 = vld [vmem:[#allocation6 + $0x158] sm:$0xff]  ;;  %v5387_v21 = vsub.f32 %v51_v20, %v218_v9  ;;  %v224_v16 = vand.u32 4294901760, %v53_v54  ;;  %v103_v9 = vld [vmem:[#allocation6 + $0x1e0] sm:$0xff] }
  0x42   :  { %7480 = vst [vmem:[#allocation47_spill] sm:$0xff] %v5362_v58  ;;  %7481 = vst [vmem:[#allocation48_spill] sm:$0xff] %v5366_v11  ;;  %v5377_v11 = vsub.f32 %v68_v44, %v269_v19  ;;  %v5379_v58 = vsub.f32 %v99_v59, %v1128_v25  ;;  %4588 = vmatprep.subr.bf16.mxu0 %v5373_v4  ;;  %4398 = vmatpush3.bf16.msra.mxu1 %v5375_v27  ;;  %v1134_v44 = vand.u32 4294901760, %v101_v46  ;;  %v104_v20 = vld [vmem:[#allocation6 + $0x1e8] sm:$0xff] }
  0x43   :  { %7482 = vst [vmem:[#allocation49_spill] sm:$0xff] %v5369_v60  ;;  %7483 = vst [vmem:[#allocation50_spill] sm:$0xff] %v5371_v26  ;;  %v5389_v3 = vsub.f32 %v52_v39, %v221_v0  ;;  %v5391_v60 = vpack.c.bf16 %v275_v35, %v272_v34  ;;  %4590 = vmatpush3.bf16.msra.mxu0 %v5383_v42  ;;  %v1137_v25 = vand.u32 4294901760, %v102_v43  ;;  %v227_v59 = vand.u32 4294901760, %v54_v2  ;;  %v88_v26 = vld [vmem:[#allocation6 + $0x168] sm:$0xff] }
  0x44   :  { %7484 = vst [vmem:[#allocation51_spill] sm:$0xff] %v5373_v4  ;;  %7485 = vst [vmem:[#allocation52_spill] sm:$0xff] %v5375_v27  ;;  %v1086_v19 = vand.u32 4294901760, %v85_v17  ;;  %v5394_v32 = vsub.f32 %v83_v50, %v1080_v49  ;;  %v1089_v4 = vand.u32 4294901760, %v86_v31  ;;  %v281_v27 = vand.u32 4294901760, %v72_v18 }
  0x45   :  { %7486 = vst [vmem:[#allocation53_spill] sm:$0xff] %v5377_v11  ;;  %7487 = vst [vmem:[#allocation54_spill] sm:$0xff] %v5379_v58  ;;  %4400 = vmatprep.subr.bf16.mxu1 %v5391_v60  ;;  %v5397_v0 = vsub.f32 %v84_v22, %v1083_v12  ;;  %v5399_v39 = vsub.f32 %v69_v38, %v272_v34  ;;  %v5401_v58 = vpack.c.bf16 %v1137_v25, %v1134_v44  ;;  %v87_v11 = vld [vmem:[#allocation6 + $0x160] sm:$0xff]  ;;  %v73_v22 = vld [vmem:[#allocation6 + $0xf0] sm:$0xff] }
  0x46   :  { %7488 = vst [vmem:[#allocation55_spill] sm:$0xff] %v5381_v30  ;;  %7489 = vst [vmem:[#allocation56_spill] sm:$0xff] %v5383_v42  ;;  %v278_v30 = vand.u32 4294901760, %v71_v55  ;;  %v5403_v42 = vpack.c.bf16 %v227_v59, %v224_v16  ;;  %v5405_v49 = vsub.f32 %v70_v5, %v275_v35  ;;  %v5407_v50 = vsub.f32 %v101_v46, %v1134_v44  ;;  %v74_v12 = vld [vmem:[#allocation6 + $0xf8] sm:$0xff] }
  0x47   :  { %7490 = vst [vmem:[#allocation57_spill] sm:$0xff] %v5387_v21  ;;  %7491 = vst [vmem:[#allocation58_spill] sm:$0xff] %v5389_v3  ;;  %v55_v3 = vld [vmem:[#allocation6 + $0x60] sm:$0xff]  ;;  %v56_v21 = vld [vmem:[#allocation6 + $0x68] sm:$0xff]  ;;  %4592 = vmatprep.subr.bf16.mxu0 %v5401_v58  ;;  %v5415_v38 = vsub.f32 %v53_v54, %v224_v16  ;;  %v5417_v34 = vsub.f32 %v54_v2, %v227_v59  ;;  %v1140_v5 = vand.u32 4294901760, %v103_v9  ;;  %v1143_v35 = vand.u32 4294901760, %v104_v20 }
  0x48   :  { %7492 = vst [vmem:[#allocation59_spill] sm:$0xff] %v5391_v60  ;;  %7493 = vst [vmem:[#allocation60_spill] sm:$0xff] %v5394_v32  ;;  %v5409_v60 = vsub.f32 %v102_v43, %v1137_v25  ;;  %v5411_v32 = vpack.c.bf16 %v1089_v4, %v1086_v19  ;;  %4402 = vmatpush3.bf16.msra.mxu1 %v5403_v42  ;;  %v230_v46 = vand.u32 4294901760, %v55_v3  ;;  %v233_v43 = vand.u32 4294901760, %v56_v21  ;;  %v105_v54 = vld [vmem:[#allocation6 + $0x1f0] sm:$0xff]  ;;  %v106_v16 = vld [vmem:[#allocation6 + $0x1f8] sm:$0xff] }
  0x49   :  { %7494 = vst [vmem:[#allocation61_spill] sm:$0xff] %v5397_v0  ;;  %7495 = vst [vmem:[#allocation62_spill] sm:$0xff] %v5399_v39  ;;  %v5419_v0 = vpack.c.bf16 %v281_v27, %v278_v30  ;;  %v1092_v44 = vand.u32 4294901760, %v87_v11  ;;  %v5422_v25 = vsub.f32 %v85_v17, %v1086_v19  ;;  %v5425_v2 = vsub.f32 %v86_v31, %v1089_v4  ;;  %v5435_v17 = vld [vmem:[#allocation6 + $0x170] sm:$0xff]  ;;  %v5445_v4 = vld [vmem:[#allocation6 + $0x178] sm:$0xff] }
  0x4a   :  { %7496 = vst [vmem:[#allocation63_spill] sm:$0xff] %v5401_v58  ;;  %7497 = vst [vmem:[#allocation64_spill] sm:$0xff] %v5403_v42  ;;  %4594 = vmatpush3.bf16.msra.mxu0 %v5411_v32  ;;  %v1095_v58 = vand.u32 4294901760, %v88_v26  ;;  %v287_v42 = vand.u32 4294901760, %v74_v12  ;;  %v5427_v59 = vsub.f32 %v71_v55, %v278_v30  ;;  %v5437_v19 = vsub.f32 %v72_v18, %v281_v27  ;;  %v5447_v30 = vld [vmem:[#allocation3] sm:$0xff] }
  0x4b   :  { %7498 = vst [vmem:[#allocation65_spill] sm:$0xff] %v5405_v49  ;;  %7499 = vst [vmem:[#allocation66_spill] sm:$0xff] %v5407_v50  ;;  %4404 = vmatprep.subr.bf16.mxu1 %v5419_v0  ;;  %v5429_v50 = vpack.c.bf16 %v1143_v35, %v1140_v5  ;;  %v5451_v31 = vsub.f32 %v55_v3, %v230_v46  ;;  %v5453_v55 = vsub.f32 %v56_v21, %v233_v43 }
  0x4c   :  { %7500 = vst [vmem:[#allocation67_spill] sm:$0xff] %v5409_v60  ;;  %7501 = vst [vmem:[#allocation68_spill] sm:$0xff] %v5411_v32  ;;  %v284_v60 = vand.u32 4294901760, %v73_v22  ;;  %v5431_v32 = vpack.c.bf16 %v233_v43, %v230_v46  ;;  %v5443_v49 = vpack.c.bf16 %v1095_v58, %v1092_v44  ;;  %v1146_v18 = vand.u32 4294901760, %v105_v54 }
  0x4d   :  { %7502 = vst [vmem:[#allocation69_spill] sm:$0xff] %v5415_v38  ;;  %7503 = vst [vmem:[#allocation70_spill] sm:$0xff] %v5417_v34  ;;  %v57_v34 = vld [vmem:[#allocation6 + $0x70] sm:$0xff]  ;;  %v5433_v38 = vld [vmem:[#allocation6 + $0x78] sm:$0xff]  ;;  %4596 = vmatprep.subr.bf16.mxu0 %v5429_v50  ;;  %v7518_v21 = vsub.s32 1, %v5250_v1  ;;  %v7519_v43 = vsub.s32 0, %v5250_v1 }
  0x4e   :  { %7504 = vst [vmem:[#allocation71_spill] sm:$0xff] %v5419_v0  ;;  %7505 = vst [vmem:[#allocation72_spill] sm:$0xff] %v5422_v25  ;;  %v5439_v0 = vsub.f32 %v103_v9, %v1140_v5  ;;  %v5441_v25 = vsub.f32 %v104_v20, %v1143_v35  ;;  %4406 = vmatpush3.bf16.msra.mxu1 %v5431_v32  ;;  %v5455_v27 = vpack.c.bf16 %v287_v42, %v284_v60 }
  0x4f   :  { %7506 = vst [vmem:[#allocation73_spill] sm:$0xff] %v5425_v2  ;;  %7507 = vst [vmem:[#allocation74_spill] sm:$0xff] %v5427_v59  ;;  %4598 = vmatpush3.bf16.msra.mxu0 %v5443_v49  ;;  %v1149_v9 = vand.u32 4294901760, %v106_v16  ;;  %v236_v20 = vand.u32 4294901760, %v57_v34  ;;  %v239_v5 = vand.u32 4294901760, %v5433_v38  ;;  %v165_v46 = vrot.slane %v5447_v30, %v7518_v21 }
  0x50   :  { %7508 = vst [vmem:[#allocation75_spill] sm:$0xff] %v5429_v50  ;;  %7509 = vst [vmem:[#allocation76_spill] sm:$0xff] %v5431_v32  ;;  %4408 = vmatprep.subr.bf16.mxu1 %v5455_v27  ;;  %v5470_v50 = vsub.f32 %v88_v26, %v1095_v58  ;;  %v5472_v32 = vsub.f32 %v73_v22, %v284_v60  ;;  %v5480_v35 = vsub.f32 %v105_v54, %v1146_v18 }
  0x51   :  { %7510 = vst [vmem:[#allocation77_spill] sm:$0xff] %v5437_v19  ;;  %7511 = vst [vmem:[#allocation78_spill] sm:$0xff] %v5439_v0  ;;  %v5474_v0 = vpack.c.bf16 %v1149_v9, %v1146_v18  ;;  %v5482_v3 = vsub.f32 %v106_v16, %v1149_v9  ;;  %v7525_v21 = vand.u32 4294901760, %v5435_v17  ;;  %v5492_v26 = vand.u32 4294901760, %v165_v46 }
  0x52   :  { %7512 = vst [vmem:[#allocation79_spill] sm:$0xff] %v5441_v25  ;;  %7513 = vst [vmem:[#allocation80_spill] sm:$0xff] %v5443_v49  ;;  %v5460_v25 = vsub.f32 %v87_v11, %v1092_v44  ;;  %v161_v49 = vrot.slane %v5447_v30, %v7519_v43  ;;  %v5476_v11 = vpack.c.bf16 %v239_v5, %v236_v20  ;;  %v7215_v60 = vand.u32 4294901760, %v5265_v29 }
  0x53   :  { %7514 = vst [vmem:[#allocation81_spill] sm:$0xff] %v5447_v30  ;;  %7515 = vst [vmem:[#allocation82_spill] sm:$0xff] %v5453_v55  ;;  %v5478_v44 = vsub.f32 %v74_v12, %v287_v42  ;;  %4600 = vmatprep.subr.bf16.mxu0 %v5474_v0  ;;  %v7212_v42 = vand.u32 4294901760, %v5257_v24  ;;  %v7530_v22 = vsub.s32 3, %v5250_v1  ;;  %v4635_v54 = vpack.c.bf16 %v5271_v40, %v5268_v33 }
  0x54   :  { %7516 = vst [vmem:[#allocation83_spill] sm:$0xff] %v5455_v27  ;;  %7517 = vst [vmem:[#allocation84_spill] sm:$0xff] %v5460_v25  ;;  %v7526_v27 = vand.u32 4294901760, %v5445_v4  ;;  %4410 = vmatpush3.bf16.msra.mxu1 %v5476_v11  ;;  %v5494_v58 = vand.u32 4294901760, %v161_v49  ;;  %v7222_v16 = vand.u32 4294901760, %v5273_v41  ;;  %v5507_v18 = vsub.f32 %v165_v46, %v5492_v26 }
  0x55   :  { %7520 = vst [vmem:[#allocation85_spill] sm:$0xff] %v5470_v50  ;;  %7521 = vst [vmem:[#allocation86_spill] sm:$0xff] %v5474_v0  ;;  %v173_v12 = vrot.slane %v5447_v30, %v7530_v22  ;;  %v421_v43 = vsub.f32 %v5257_v24, %v7212_v42  ;;  %v7533_v46 = vand.u32 4294901760, %v5277_v47 }
  0x56   :  { %7522 = vst [vmem:[#allocation87_spill] sm:$0xff] %v5476_v11  ;;  %7523 = vst [vmem:[#allocation88_spill] sm:$0xff] %v5480_v35  ;;  %v5488_v25 = vpack.c.bf16 %v7526_v27, %v7525_v21  ;;  %v5510_v9 = vsub.f32 %v161_v49, %v5494_v58  ;;  %v428_v21 = vsub.f32 %v5265_v29, %v7215_v60  ;;  %v7227_v42 = vand.u32 4294901760, %v5507_v18 }
  0x57   :  { %7524 = vst [vmem:[#allocation89_spill] sm:$0xff] %v5482_v3  ;;  %7528 = vst [vmem:[#allocation91_spill] sm:$0xff] %v5492_v26  ;;  %v5518_v22 = vand.u32 4294901760, %v173_v12  ;;  %v309_v27 = vsub.f32 %v5273_v41, %v7222_v16  ;;  %v316_v49 = vsub.f32 %v5277_v47, %v7533_v46  ;;  %v422_v60 = vand.u32 4294901760, %v421_v43 }
  0x58   :  { %7527 = vst [vmem:[#allocation90_spill] sm:$0xff] %v5488_v25  ;;  %7529 = vst [vmem:[#allocation92_spill] sm:$0xff] %v5494_v58  ;;  %4602 = vmatpush3.bf16.msra.mxu0 %v5488_v25  ;;  %v7534_v25 = vsub.s32 2, %v5250_v1  ;;  %v7229_v11 = vand.u32 4294901760, %v5510_v9  ;;  %v429_v58 = vand.u32 4294901760, %v428_v21  ;;  %v5536_v41 = vsub.f32 %v57_v34, %v236_v20  ;;  %v7542_v1 = vld [vmem:[#allocation53_spill] sm:$0xff] }
  0x59   :  { %7531 = vst [vmem:[#allocation93_spill] sm:$0xff] %v5510_v9  ;;  %7532 = vst [vmem:[#allocation94_spill] sm:$0xff] %v5518_v22  ;;  %4636 = vmatprep.subr.bf16.mxu0 %v4635_v54  ;;  %v5532_v54 = vsub.f32 %v173_v12, %v5518_v22  ;;  %v310_v29 = vand.u32 4294901760, %v309_v27  ;;  %v317_v24 = vand.u32 4294901760, %v316_v49  ;;  %v292_v46 = vsub.f32 %v5507_v18, %v7227_v42 }
  0x5a   :  { %v169_v0 = vrot.slane %v5447_v30, %v7534_v25  ;;  %v298_v25 = vsub.f32 %v5510_v9, %v7229_v11  ;;  %v4411_v30 = vpack.c.bf16 %v429_v58, %v422_v60  ;;  %v5545_v43 = vsub.f32 %v5433_v38, %v239_v5 }
  0x5b   :  { %7535 = vst [vmem:[#allocation95_spill] sm:$0xff] %v5532_v54  ;;  %v7228_v12 = vand.u32 4294901760, %v5532_v54  ;;  %v7232_v34 = vand.u32 4294901760, %v5288_v53  ;;  %v293_v20 = vand.u32 4294901760, %v292_v46  ;;  %v4413_v49 = vpack.c.bf16 %v317_v24, %v310_v29 }
  0x5c   :  { %v5534_v16 = vand.u32 4294901760, %v169_v0  ;;  %v299_v21 = vand.u32 4294901760, %v298_v25  ;;  %4412 = vmatprep.subr.bf16.mxu1 %v4411_v30  ;;  %v7230_v42 = vand.u32 4294901760, %v5292_v62  ;;  %v4637_v60 = vpack.c.bf16 %v5286_v52, %v5279_v48 }
  0x5d   :  { %v1154_v58 = vsub.f32 %v5532_v54, %v7228_v12  ;;  %v435_v5 = vsub.f32 %v5288_v53, %v7232_v34  ;;  %294 = vmatprep.mubr.f32.mxu1 %v293_v20  ;;  %v7236_v29 = vand.u32 4294901760, %v5307_v13  ;;  %v7237_v30 = vand.u32 4294901760, %v5318_v36 }
  0x5e   :  { %7536 = vst [vmem:[#allocation96_spill] sm:$0xff] %v5534_v16  ;;  %v5549_v27 = vsub.f32 %v169_v0, %v5534_v16  ;;  %v7233_v0 = vand.u32 4294901760, %v5300_v7  ;;  %v442_v24 = vsub.f32 %v5292_v62, %v7230_v42  ;;  %300 = vmatmul.mubr.f32.vlgmr.msra.gmra.mrb[0].mxu1 %v299_v21 }
  0x5f   :  { %v1155_v46 = vand.u32 4294901760, %v1154_v58  ;;  %v436_v12 = vand.u32 4294901760, %v435_v5  ;;  %4414 = vmatpush3.bf16.msra.mxu1 %v4413_v49  ;;  %v330_v42 = vsub.f32 %v5307_v13, %v7236_v29  ;;  %v449_v21 = vsub.f32 %v5318_v36, %v7237_v30  ;;  %530 = vmatprep.mubr.f32.mxu1 %v5492_v26  ;;  %v7539_v26 = vld [vmem:[#allocation50_spill] sm:$0xff] }
  0x60   :  { %7537 = vst [vmem:[#allocation97_spill] sm:$0xff] %v5549_v27  ;;  %v7231_v38 = vand.u32 4294901760, %v5549_v27  ;;  %v323_v20 = vsub.f32 %v5300_v7, %v7233_v0  ;;  %v443_v11 = vand.u32 4294901760, %v442_v24  ;;  %v7238_v58 = vand.u32 4294901760, %v5320_v37 }
  0x61   :  { %1156 = vmatprep.mubr.f32.mxu0 %v1155_v46  ;;  %v7239_v49 = vand.u32 4294901760, %v5330_v23  ;;  %v331_v0 = vand.u32 4294901760, %v330_v42  ;;  %v450_v16 = vand.u32 4294901760, %v449_v21  ;;  %v4641_v30 = vpack.c.bf16 %v5311_v15, %v5309_v14 }
  0x62   :  { %v1160_v25 = vsub.f32 %v5549_v27, %v7231_v38  ;;  %v4639_v38 = vpack.c.bf16 %v5298_v6, %v5294_v63  ;;  %v324_v34 = vand.u32 4294901760, %v323_v20  ;;  %v4415_v24 = vpack.c.bf16 %v443_v11, %v436_v12 }
  0x63   :  { %v456_v29 = vsub.f32 %v5320_v37, %v7238_v58  ;;  %v337_v46 = vsub.f32 %v5330_v23, %v7239_v49  ;;  %v7241_v20 = vand.u32 4294901760, %v5345_v8  ;;  %v4643_v12 = vpack.c.bf16 %v5328_v28, %v5326_v56 }
  0x64   :  { %v1161_v5 = vand.u32 4294901760, %v1160_v25  ;;  %v7240_v25 = vand.u32 4294901760, %v5335_v45  ;;  %4416 = vmatprep.subr.bf16.mxu1 %v4415_v24  ;;  %v4417_v11 = vpack.c.bf16 %v331_v0, %v324_v34  ;;  %v7247_v21 = vand.u32 4294901760, %v5347_v61 }
  0x65   :  { %v457_v42 = vand.u32 4294901760, %v456_v29  ;;  %v463_v49 = vsub.f32 %v5345_v8, %v7241_v20  ;;  %v4645_v0 = vpack.c.bf16 %v5342_v51, %v5338_v57  ;;  %v7538_v29 = vld [vmem:[#allocation46_spill] sm:$0xff]  ;;  %v7264_v9 = vand.u32 4294901760, %v7539_v26 }
  0x66   :  { %1162 = vmatmul.mubr.f32.vlgmr.msra.gmra.mrb[0].mxu0 %v1161_v5  ;;  %v338_v5 = vand.u32 4294901760, %v337_v46  ;;  %v344_v58 = vsub.f32 %v5335_v45, %v7240_v25  ;;  %4418 = vmatpush3.bf16.msra.mxu1 %v4417_v11  ;;  %v7261_v24 = vand.u32 4294901760, %v7538_v29  ;;  %v7540_v11 = vld [vmem:[#allocation41_spill] sm:$0xff]  ;;  %v7544_v45 = vld [vmem:[#allocation58_spill] sm:$0xff] }
  0x67   :  { %4638 = vmatpush3.bf16.msra.mxu0 %v4637_v60  ;;  %v7252_v60 = vand.u32 4294901760, %v5358_v10  ;;  %1529 = vmatprep.mubr.f32.mxu0 %v5532_v54  ;;  %v4419_v34 = vpack.c.bf16 %v457_v42, %v450_v16  ;;  %v464_v25 = vand.u32 4294901760, %v463_v49  ;;  %v7541_v42 = vld [vmem:[#allocation44_spill] sm:$0xff]  ;;  %v7269_v23 = vand.u32 4294901760, %v7544_v45 }
  0x68   :  { %4640 = vmatprep.subr.bf16.mxu0 %v4639_v38  ;;  %v470_v38 = vsub.f32 %v5347_v61, %v7247_v21  ;;  %v345_v46 = vand.u32 4294901760, %v344_v58  ;;  %v4647_v54 = vpack.c.bf16 %v7541_v42, %v7540_v11  ;;  %v358_v21 = vsub.f32 %v7538_v29, %v7261_v24  ;;  %v7545_v24 = vld [vmem:[#allocation48_spill] sm:$0xff]  ;;  %v7546_v29 = vld [vmem:[#allocation49_spill] sm:$0xff] }
  0x69   :  { %v351_v20 = vsub.f32 %v5358_v10, %v7252_v60  ;;  %4420 = vmatprep.subr.bf16.mxu1 %v4419_v34  ;;  %v7263_v61 = vand.u32 4294901760, %v7542_v1  ;;  %v477_v60 = vsub.f32 %v7539_v26, %v7264_v9  ;;  %v7543_v10 = vld [vmem:[#allocation57_spill] sm:$0xff]  ;;  %v7548_v9 = vld [vmem:[#allocation54_spill] sm:$0xff] }
  0x6a   :  { %v471_v16 = vand.u32 4294901760, %v470_v38  ;;  %v4421_v58 = vpack.c.bf16 %v345_v46, %v338_v5  ;;  %v359_v38 = vand.u32 4294901760, %v358_v21  ;;  %v7271_v46 = vand.u32 4294901760, %v5399_v39 }
  0x6b   :  { %4642 = vmatpush3.bf16.msra.mxu0 %v4641_v30  ;;  %v352_v49 = vand.u32 4294901760, %v351_v20  ;;  %v7267_v30 = vand.u32 4294901760, %v7543_v10  ;;  %v484_v8 = vsub.f32 %v7542_v1, %v7263_v61  ;;  %v478_v5 = vand.u32 4294901760, %v477_v60  ;;  %v7547_v61 = vld [vmem:[#allocation65_spill] sm:$0xff]  ;;  %v7549_v1 = vld [vmem:[#allocation55_spill] sm:$0xff] }
  0x6c   :  { %4644 = vmatprep.subr.bf16.mxu0 %v4643_v12  ;;  %v4423_v34 = vpack.c.bf16 %v471_v16, %v464_v25  ;;  %4422 = vmatpush3.bf16.msra.mxu1 %v4421_v58  ;;  %v4649_v12 = vpack.c.bf16 %v7546_v29, %v7545_v24  ;;  %v372_v16 = vsub.f32 %v7544_v45, %v7269_v23  ;;  %v7272_v58 = vand.u32 4294901760, %v7547_v61  ;;  %v7553_v45 = vld [vmem:[#allocation61_spill] sm:$0xff] }
  0x6d   :  { %v365_v20 = vsub.f32 %v7543_v10, %v7267_v30  ;;  %v4425_v25 = vpack.c.bf16 %v359_v38, %v352_v49  ;;  %v485_v21 = vand.u32 4294901760, %v484_v8  ;;  %v4651_v60 = vpack.c.bf16 %v7549_v1, %v7548_v9  ;;  %v7550_v10 = vld [vmem:[#allocation69_spill] sm:$0xff]  ;;  %v7551_v38 = vld [vmem:[#allocation70_spill] sm:$0xff] }
  0x6e   :  { %4424 = vmatprep.subr.bf16.mxu1 %v4423_v34  ;;  %v491_v30 = vsub.f32 %v5399_v39, %v7271_v46  ;;  %v373_v49 = vand.u32 4294901760, %v372_v16  ;;  %v498_v8 = vsub.f32 %v7547_v61, %v7272_v58  ;;  %v7277_v23 = vand.u32 4294901760, %v7551_v38  ;;  %v7554_v58 = vld [vmem:[#allocation66_spill] sm:$0xff]  ;;  %v7555_v61 = vld [vmem:[#allocation67_spill] sm:$0xff] }
  0x6f   :  { %4646 = vmatpush3.bf16.msra.mxu0 %v4645_v0  ;;  %v366_v26 = vand.u32 4294901760, %v365_v20  ;;  %v7276_v0 = vand.u32 4294901760, %v7550_v10  ;;  %v4427_v34 = vpack.c.bf16 %v485_v21, %v478_v5  ;;  %v7279_v46 = vand.u32 4294901760, %v5427_v59 }
  0x70   :  { %4648 = vmatprep.subr.bf16.mxu0 %v4647_v54  ;;  %4426 = vmatpush3.bf16.msra.mxu1 %v4425_v25  ;;  %v7552_v54 = vld [vmem:[#allocation60_spill] sm:$0xff]  ;;  %v492_v1 = vand.u32 4294901760, %v491_v30  ;;  %v499_v21 = vand.u32 4294901760, %v498_v8  ;;  %v386_v16 = vsub.f32 %v7551_v38, %v7277_v23  ;;  %v7280_v25 = vand.u32 4294901760, %v5437_v19 }
  0x71   :  { %v4653_v29 = vpack.c.bf16 %v7553_v45, %v7552_v54  ;;  %v379_v20 = vsub.f32 %v7550_v10, %v7276_v0  ;;  %4428 = vmatprep.subr.bf16.mxu1 %v4427_v34  ;;  %v4429_v5 = vpack.c.bf16 %v373_v49, %v366_v26  ;;  %v4655_v30 = vpack.c.bf16 %v7555_v61, %v7554_v58 }
  0x72   :  { %v505_v0 = vsub.f32 %v5427_v59, %v7279_v46  ;;  %v4431_v34 = vpack.c.bf16 %v499_v21, %v492_v1  ;;  %v387_v26 = vand.u32 4294901760, %v386_v16  ;;  %v512_v49 = vsub.f32 %v5437_v19, %v7280_v25  ;;  %v7557_v25 = vld [vmem:[#allocation78_spill] sm:$0xff]  ;;  %v7558_v19 = vld [vmem:[#allocation79_spill] sm:$0xff] }
  0x73   :  { %4650 = vmatpush3.bf16.msra.mxu0 %v4649_v12  ;;  %v380_v39 = vand.u32 4294901760, %v379_v20  ;;  %v7285_v12 = vand.u32 4294901760, %v5451_v31  ;;  %v7286_v8 = vand.u32 4294901760, %v5453_v55  ;;  %v7289_v46 = vand.u32 4294901760, %v5472_v32 }
  0x74   :  { %4652 = vmatprep.subr.bf16.mxu0 %v4651_v60  ;;  %4430 = vmatpush3.bf16.msra.mxu1 %v4429_v5  ;;  %v7556_v60 = vld [vmem:[#allocation72_spill] sm:$0xff]  ;;  %v506_v38 = vand.u32 4294901760, %v505_v0  ;;  %v513_v21 = vand.u32 4294901760, %v512_v49  ;;  %v7290_v5 = vand.u32 4294901760, %v5478_v44  ;;  %v4659_v0 = vpack.c.bf16 %v7558_v19, %v7557_v25 }
  0x75   :  { %v4657_v23 = vpack.c.bf16 %v5425_v2, %v7556_v60  ;;  %v393_v20 = vsub.f32 %v5451_v31, %v7285_v12  ;;  %4432 = vmatprep.subr.bf16.mxu1 %v4431_v34  ;;  %v4433_v1 = vpack.c.bf16 %v387_v26, %v380_v39  ;;  %v400_v16 = vsub.f32 %v5453_v55, %v7286_v8 }
  0x76   :  { %v519_v12 = vsub.f32 %v5472_v32, %v7289_v46  ;;  %v4435_v34 = vpack.c.bf16 %v513_v21, %v506_v38  ;;  %v526_v26 = vsub.f32 %v5478_v44, %v7290_v5 }
  0x77   :  { %4654 = vmatpush3.bf16.msra.mxu0 %v4653_v29  ;;  %v394_v59 = vand.u32 4294901760, %v393_v20  ;;  %v7291_v29 = vand.u32 4294901760, %v5536_v41  ;;  %v401_v39 = vand.u32 4294901760, %v400_v16  ;;  %v7561_v20 = vand.u32 4294901760, %v5445_v4  ;;  %v7563_v16 = vld [vmem:[#allocation84_spill] sm:$0xff] }
  0x78   :  { %4656 = vmatprep.subr.bf16.mxu0 %v4655_v30  ;;  %v7559_v30 = vand.u32 4294901760, %v5435_v17  ;;  %4434 = vmatpush3.bf16.msra.mxu1 %v4433_v1  ;;  %v520_v46 = vand.u32 4294901760, %v519_v12  ;;  %v4661_v5 = vpack.c.bf16 %v5470_v50, %v7563_v16  ;;  %v527_v49 = vand.u32 4294901760, %v526_v26  ;;  %v7565_v26 = vld [vmem:[#allocation14_spill] sm:$0xff] }
  0x79   :  { %v5698_v55 = vsub.f32 %v5445_v4, %v7561_v20  ;;  %v407_v38 = vsub.f32 %v5536_v41, %v7291_v29  ;;  %4436 = vmatprep.subr.bf16.mxu1 %v4435_v34  ;;  %v4437_v21 = vpack.c.bf16 %v401_v39, %v394_v59  ;;  %v4663_v4 = vpack.c.bf16 %v5482_v3, %v5480_v35 }
  0x7a   :  { %v5693_v8 = vsub.f32 %v5435_v17, %v7559_v30  ;;  %v7564_v17 = vand.u32 4294901760, %v5545_v43  ;;  %v7299_v1 = vand.u32 4294901760, %v5268_v33  ;;  %v7292_v20 = vand.u32 4294901760, %v5271_v40 }
  0x7b   :  { %7562 = vst [vmem:[#allocation98_spill] sm:$0xff] %v5698_v55  ;;  %4658 = vmatpush3.bf16.msra.mxu0 %v4657_v23  ;;  %v408_v12 = vand.u32 4294901760, %v407_v38  ;;  %v4439_v23 = vpack.c.bf16 %v527_v49, %v520_v46  ;;  %v7296_v29 = vand.u32 4294901760, %v5279_v48  ;;  %v7293_v38 = vand.u32 4294901760, %v5286_v52 }
  0x7c   :  { %7560 = vst [vmem:[#allocation69_spill] sm:$0xff] %v5693_v8  ;;  %v414_v30 = vsub.f32 %v5545_v43, %v7564_v17  ;;  %4660 = vmatprep.subr.bf16.mxu0 %v4659_v0  ;;  %4438 = vmatpush3.bf16.msra.mxu1 %v4437_v21  ;;  %v4665_v59 = vpack.c.bf16 %v5698_v55, %v5693_v8  ;;  %v7566_v17 = vld [vmem:[#allocation17_spill] sm:$0xff]  ;;  %v7295_v49 = vand.u32 4294901760, %v5294_v63  ;;  %v7294_v21 = vand.u32 4294901760, %v5298_v6 }
  0x7d   :  { %4440 = vmatprep.subr.bf16.mxu1 %v4439_v23  ;;  %v4443_v0 = vpack.c.bf16 %v7566_v17, %v7565_v26  ;;  %v4699_v46 = vpack.c.bf16 %v7292_v20, %v7299_v1  ;;  %v7298_v23 = vand.u32 4294901760, %v5309_v14  ;;  %v7568_v20 = vld [vmem:[#allocation92_spill] sm:$0xff] }
  0x7e   :  { %v415_v34 = vand.u32 4294901760, %v414_v30 }
  0x7f   :  { %4662 = vmatpush3.bf16.msra.mxu0 %v4661_v5  ;;  %v7567_v5 = vld [vmem:[#allocation18_spill] sm:$0xff] }
  0x80   :  { %v4441_v39 = vpack.c.bf16 %v415_v34, %v408_v12  ;;  %4664 = vmatprep.subr.bf16.mxu0 %v4663_v4  ;;  %v4445_v30 = vpack.c.bf16 %v5277_v47, %v7567_v5  ;;  %v4701_v4 = vpack.c.bf16 %v7293_v38, %v7296_v29  ;;  %v4447_v12 = vpack.c.bf16 %v5292_v62, %v5288_v53  ;;  %v7579_v47 = vld [vmem:[#allocation50_spill] sm:$0xff] }
  0x81   :  { %v7297_v34 = vand.u32 4294901760, %v5311_v15  ;;  %v4449_v38 = vpack.c.bf16 %v5307_v13, %v5300_v7  ;;  %v7309_v29 = vand.u32 4294901760, %v5342_v51  ;;  %v7577_v51 = vld [vmem:[#allocation45_spill] sm:$0xff] }
  0x82   :  { %4442 = vmatpush3.bf16.msra.mxu1 %v4441_v39  ;;  %v4703_v39 = vpack.c.bf16 %v7294_v21, %v7295_v49  ;;  %v4451_v21 = vpack.c.bf16 %v5320_v37, %v5318_v36  ;;  %v7310_v49 = vand.u32 4294901760, %v5338_v57  ;;  %v7606_v57 = vand.u32 4294901760, %v5307_v13 }
  0x83   :  { %4666 = vmatpush3.bf16.msra.mxu0 %v4665_v59  ;;  %4444 = vmatprep.subr.bf16.mxu1 %v4443_v0  ;;  %v7301_v59 = vand.u32 4294901760, %v5326_v56  ;;  %v7300_v0 = vand.u32 4294901760, %v5328_v28  ;;  %v5901_v56 = vld [vmem:[#allocation6 + $0x228] sm:$0xff] }
  0x84   :  { %4700 = vmatprep.subr.bf16.mxu0 %v4699_v46  ;;  %v4705_v46 = vpack.c.bf16 %v7297_v34, %v7298_v23  ;;  %v7569_v34 = vld [vmem:[#allocation33_spill] sm:$0xff]  ;;  %v7570_v23 = vld [vmem:[#allocation35_spill] sm:$0xff] }
  0x85   :  { %532 = vmatmul.mubr.f32.vlgmr.msra.gmra.mrb[2].mxu1 %v7568_v20  ;;  %v4453_v1 = vpack.c.bf16 %v7570_v23, %v7569_v34 }
  0x86   :  { %4446 = vmatpush3.bf16.msra.mxu1 %v4445_v30  ;;  %1532 = vmatmul.mubr.f32.vlgmr.msra.gmra.mrb[2].mxu0 %v5549_v27  ;;  %v4707_v30 = vpack.c.bf16 %v7300_v0, %v7301_v59  ;;  %v7571_v0 = vld [vmem:[#allocation39_spill] sm:$0xff]  ;;  %v7572_v59 = vld [vmem:[#allocation40_spill] sm:$0xff]  ;;  %v7573_v27 = vld [vmem:[#allocation49_spill] sm:$0xff] }
  0x87   :  { %4702 = vmatpush3.bf16.msra.mxu0 %v4701_v4  ;;  %4448 = vmatprep.subr.bf16.mxu1 %v4447_v12  ;;  %v4455_v4 = vpack.c.bf16 %v7572_v59, %v7571_v0  ;;  %v7315_v12 = vand.u32 4294901760, %v7545_v24  ;;  %v7314_v20 = vand.u32 4294901760, %v7573_v27  ;;  %v7581_v27 = vld [vmem:[#allocation57_spill] sm:$0xff]  ;;  %v7583_v24 = vld [vmem:[#allocation62_spill] sm:$0xff] }
  0x88   :  { %4704 = vmatprep.subr.bf16.mxu0 %v4703_v39  ;;  %667 = vmatprep.mubr.f32.mxu1 %v5507_v18  ;;  %v4709_v39 = vpack.c.bf16 %v7309_v29, %v7310_v49  ;;  %v7578_v29 = vld [vmem:[#allocation46_spill] sm:$0xff] }
  0x89   :  { %1806 = vmatprep.mubr.f32.mxu0 %v5518_v22  ;;  %v7575_v22 = vand.u32 4294901760, %v7541_v42  ;;  %v4457_v49 = vpack.c.bf16 %v7578_v29, %v7577_v51 }
  0x8a   :  { %4450 = vmatpush3.bf16.msra.mxu1 %v4449_v38  ;;  %v7574_v38 = vand.u32 4294901760, %v7540_v11  ;;  %v7580_v11 = vld [vmem:[#allocation53_spill] sm:$0xff] }
  0x8b   :  { %4706 = vmatpush3.bf16.msra.mxu0 %v4705_v46  ;;  %4452 = vmatprep.subr.bf16.mxu1 %v4451_v21  ;;  %v7320_v21 = vand.u32 4294901760, %v7548_v9  ;;  %v7576_v46 = vld [vmem:[#allocation55_spill] sm:$0xff]  ;;  %v4459_v5 = vpack.c.bf16 %v7580_v11, %v7579_v47  ;;  %v7584_v9 = vld [vmem:[#allocation65_spill] sm:$0xff] }
  0x8c   :  { %4708 = vmatprep.subr.bf16.mxu0 %v4707_v30  ;;  %v4711_v62 = vpack.c.bf16 %v7575_v22, %v7574_v38  ;;  %v7319_v53 = vand.u32 4294901760, %v7576_v46  ;;  %v4713_v30 = vpack.c.bf16 %v7314_v20, %v7315_v12  ;;  %v7322_v22 = vand.u32 4294901760, %v7552_v54  ;;  %v7582_v20 = vld [vmem:[#allocation58_spill] sm:$0xff] }
  0x8d   :  { %v7321_v38 = vand.u32 4294901760, %v7553_v45  ;;  %v4461_v12 = vpack.c.bf16 %v7582_v20, %v7581_v27  ;;  %v4463_v42 = vpack.c.bf16 %v7584_v9, %v7583_v24  ;;  %v7586_v45 = vld [vmem:[#allocation74_spill] sm:$0xff]  ;;  %v7605_v46 = vand.u32 4294901760, %v5300_v7 }
  0x8e   :  { %4454 = vmatpush3.bf16.msra.mxu1 %v4453_v1  ;;  %v4715_v1 = vpack.c.bf16 %v7319_v53, %v7320_v21  ;;  %v7330_v53 = vand.u32 4294901760, %v7556_v60  ;;  %v7329_v21 = vand.u32 4294901760, %v5425_v2  ;;  %v5824_v60 = vld [vmem:[#allocation6 + $0x280] sm:$0xff]  ;;  %v7610_v7 = vand.u32 4294901760, %v5320_v37 }
  0x8f   :  { %4710 = vmatpush3.bf16.msra.mxu0 %v4709_v39  ;;  %4456 = vmatprep.subr.bf16.mxu1 %v4455_v4  ;;  %v7327_v4 = vand.u32 4294901760, %v7554_v58  ;;  %v7326_v39 = vand.u32 4294901760, %v7555_v61  ;;  %v7587_v58 = vld [vmem:[#allocation77_spill] sm:$0xff]  ;;  %v5830_v2 = vld [vmem:[#allocation6 + $0x200] sm:$0xff]  ;;  %v5871_v61 = vld [vmem:[#allocation6 + $0x218] sm:$0xff]  ;;  %v5894_v28 = vpack.c.bf16 %v7606_v57, %v7605_v46  ;;  %v7614_v37 = vand.u32 4294901760, %v7572_v59 }
  0x90   :  { %4712 = vmatprep.subr.bf16.mxu0 %v4711_v62  ;;  %v4717_v62 = vpack.c.bf16 %v7321_v38, %v7322_v22  ;;  %v7585_v38 = vld [vmem:[#allocation70_spill] sm:$0xff]  ;;  %v4467_v54 = vpack.c.bf16 %v7587_v58, %v7586_v45  ;;  %v7617_v57 = vand.u32 4294901760, %v7577_v51  ;;  %v7623_v51 = vld [vmem:[#allocation21_spill] sm:$0xff] }
  0x91   :  { %v4465_v22 = vpack.c.bf16 %v7585_v38, %v7550_v10  ;;  %v5976_v59 = vld [vmem:[#allocation6 + $0x238] sm:$0xff] }
  0x92   :  { %4458 = vmatpush3.bf16.msra.mxu1 %v4457_v49  ;;  %v4719_v49 = vpack.c.bf16 %v7326_v39, %v7327_v4  ;;  %v7339_v4 = vand.u32 4294901760, %v5470_v50 }
  0x93   :  { %4714 = vmatpush3.bf16.msra.mxu0 %v4713_v30  ;;  %4460 = vmatprep.subr.bf16.mxu1 %v4459_v5  ;;  %v7334_v5 = vand.u32 4294901760, %v7557_v25  ;;  %v7333_v30 = vand.u32 4294901760, %v7558_v19  ;;  %v5842_v19 = vld [vmem:[#allocation6 + $0x290] sm:$0xff]  ;;  %v5844_v25 = vld [vmem:[#allocation6 + $0x298] sm:$0xff] }
  0x94   :  { %4716 = vmatprep.subr.bf16.mxu0 %v4715_v1  ;;  %v4721_v1 = vpack.c.bf16 %v7329_v21, %v7330_v53  ;;  %v5826_v21 = vld [vmem:[#allocation6 + $0x288] sm:$0xff]  ;;  %v7588_v53 = vld [vmem:[#allocation82_spill] sm:$0xff] }
  0x95   :  { %v4469_v39 = vpack.c.bf16 %v7588_v53, %v5451_v31 }
  0x96   :  { %4462 = vmatpush3.bf16.msra.mxu1 %v4461_v12  ;;  %v4723_v12 = vpack.c.bf16 %v7333_v30, %v7334_v5  ;;  %v4471_v5 = vpack.c.bf16 %v5478_v44, %v5472_v32 }
  0x97   :  { %4718 = vmatpush3.bf16.msra.mxu0 %v4717_v62  ;;  %4464 = vmatprep.subr.bf16.mxu1 %v4463_v42  ;;  %v4473_v62 = vpack.c.bf16 %v5545_v43, %v5536_v41  ;;  %v7596_v42 = vand.u32 4294901760, %v5826_v21 }
  0x98   :  { %4720 = vmatprep.subr.bf16.mxu0 %v4719_v49  ;;  %v7589_v49 = vand.u32 4294901760, %v7563_v16  ;;  %v5869_v16 = vld [vmem:[#allocation6 + $0x210] sm:$0xff] }
  0x9a   :  { %4466 = vmatpush3.bf16.msra.mxu1 %v4465_v22  ;;  %v4725_v30 = vpack.c.bf16 %v7339_v4, %v7589_v49  ;;  %v5840_v22 = vld [vmem:[#allocation6 + $0x208] sm:$0xff] }
  0x9b   :  { %4722 = vmatpush3.bf16.msra.mxu0 %v4721_v1  ;;  %4468 = vmatprep.subr.bf16.mxu1 %v4467_v54  ;;  %v7590_v54 = vand.u32 4294901760, %v5480_v35  ;;  %v7591_v1 = vand.u32 4294901760, %v5482_v3  ;;  %v7594_v4 = vld [vmem:[#allocation12_spill] sm:$0xff] }
  0x9c   :  { %4724 = vmatprep.subr.bf16.mxu0 %v4723_v12  ;;  %v180_v3 = vsub.s32 5, %v7594_v4  ;;  %v7598_v12 = vld [vmem:[#allocation81_spill] sm:$0xff] }
  0x9d   :  { %v4727_v50 = vpack.c.bf16 %v7591_v1, %v7590_v54  ;;  %v7592_v54 = vand.u32 4294901760, %v5693_v8  ;;  %v7593_v1 = vand.u32 4294901760, %v5698_v55 }
  0x9e   :  { %4470 = vmatpush3.bf16.msra.mxu1 %v4469_v39  ;;  %v7595_v39 = vand.u32 4294901760, %v5824_v60  ;;  %v181_v55 = vrot.slane %v7598_v12, %v180_v3  ;;  %v7607_v3 = vld [vmem:[#allocation13_spill] sm:$0xff] }
  0x9f   :  { %4726 = vmatpush3.bf16.msra.mxu0 %v4725_v30  ;;  %4472 = vmatprep.subr.bf16.mxu1 %v4471_v5  ;;  %v4729_v49 = vpack.c.bf16 %v7593_v1, %v7592_v54  ;;  %v5873_v30 = vld [vmem:[#allocation6 + $0x2a0] sm:$0xff]  ;;  %v5875_v5 = vld [vmem:[#allocation6 + $0x2a8] sm:$0xff]  ;;  %v7599_v54 = vand.u32 4294901760, %v5830_v2 }
  0xa0   :  { %4728 = vmatprep.subr.bf16.mxu0 %v4727_v50  ;;  %v5867_v35 = vpack.c.bf16 %v7596_v42, %v7595_v39  ;;  %v7600_v50 = vand.u32 4294901760, %v5840_v22  ;;  %v7602_v42 = vand.u32 4294901760, %v5842_v19  ;;  %v7603_v39 = vand.u32 4294901760, %v5844_v25 }
  0xa1   :  { %v5903_v17 = vand.u32 4294901760, %v181_v55 }
  0xa2   :  { %7597 = vst [vmem:[#allocation14_spill] sm:$0xff] %v5867_v35  ;;  %4474 = vmatpush3.bf16.msra.mxu1 %v4473_v62  ;;  %v5882_v1 = vpack.c.bf16 %v7600_v50, %v7599_v54  ;;  %v5888_v8 = vpack.c.bf16 %v7603_v39, %v7602_v42  ;;  %v5899_v50 = vld [vmem:[#allocation6 + $0x220] sm:$0xff]  ;;  %v7609_v42 = vand.u32 4294901760, %v5318_v36  ;;  %v7611_v39 = vand.u32 4294901760, %v7569_v34 }
  0xa3   :  { %4730 = vmatpush3.bf16.msra.mxu0 %v4729_v49  ;;  %4476 = vmatprep.subr.bf16.mxu1 %v7607_v3  ;;  %7608 = vst [vmem:[#allocation39_spill] sm:$0xff] %v5903_v17  ;;  %v5914_v49 = vld [vmem:[#allocation6 + $0x2b0] sm:$0xff]  ;;  %v7612_v54 = vand.u32 4294901760, %v7570_v23  ;;  %v7613_v36 = vand.u32 4294901760, %v7571_v0  ;;  %v5932_v46 = vsub.f32 %v181_v55, %v5903_v17  ;;  %v7618_v34 = vand.u32 4294901760, %v7578_v29  ;;  %v7620_v0 = vld [vmem:[#allocation96_spill] sm:$0xff] }
  0xa4   :  { %7601 = vst [vmem:[#allocation33_spill] sm:$0xff] %v5882_v1  ;;  %7604 = vst [vmem:[#allocation35_spill] sm:$0xff] %v5888_v8  ;;  %v5909_v13 = vpack.c.bf16 %v7610_v7, %v7609_v42  ;;  %4764 = vmatprep.subr.bf16.mxu0 %v5867_v35  ;;  %v7615_v7 = vld [vmem:[#allocation93_spill] sm:$0xff]  ;;  %v5929_v35 = vld [vmem:[#allocation6 + $0x2b8] sm:$0xff]  ;;  %v7624_v29 = vand.u32 4294901760, %v5869_v16 }
  0xa5   :  { %v5920_v62 = vpack.c.bf16 %v7612_v54, %v7611_v39  ;;  %v5926_v42 = vpack.c.bf16 %v7614_v37, %v7613_v36  ;;  %670 = vmatmul.mubr.f32.vlgmr.msra.gmra.mrb[4].mxu1 %v7615_v7  ;;  %7616 = vst [vmem:[#allocation40_spill] sm:$0xff] %v5932_v46  ;;  %v5938_v23 = vpack.c.bf16 %v7618_v34, %v7617_v57  ;;  %v7619_v54 = vld [vmem:[#allocation16_spill] sm:$0xff]  ;;  %v7621_v36 = vand.u32 4294901760, %v7579_v47 }
  0xa6   :  { %4478 = vmatpush3.bf16.msra.mxu1 %v7619_v54  ;;  %1808 = vmatmul.mubr.f32.vlgmr.msra.gmra.mrb[4].mxu0 %v7620_v0  ;;  %v7622_v37 = vand.u32 4294901760, %v7580_v11  ;;  %v7625_v57 = vand.u32 4294901760, %v5871_v61  ;;  %v7627_v47 = vand.u32 4294901760, %v7581_v27  ;;  %v7628_v11 = vand.u32 4294901760, %v7582_v20  ;;  %v6103_v3 = vld [vmem:[#allocation6 + $0x268] sm:$0xff] }
  0xa7   :  { %4766 = vmatpush3.bf16.msra.mxu0 %v5882_v1  ;;  %4480 = vmatprep.subr.bf16.mxu1 %v7623_v51  ;;  %v7631_v1 = vand.u32 4294901760, %v5875_v5  ;;  %v7633_v27 = vand.u32 4294901760, %v5507_v18  ;;  %v7634_v20 = vand.u32 4294901760, %v7583_v24  ;;  %v7637_v39 = vand.u32 4294901760, %v7550_v10  ;;  %v7644_v10 = vld [vmem:[#allocation25_spill] sm:$0xff] }
  0xa8   :  { %v5948_v55 = vpack.c.bf16 %v7622_v37, %v7621_v36  ;;  %v5956_v34 = vpack.c.bf16 %v7625_v57, %v7624_v29  ;;  %v5964_v36 = vpack.c.bf16 %v7628_v11, %v7627_v47  ;;  %4768 = vmatprep.subr.bf16.mxu0 %v5888_v8  ;;  %v7630_v37 = vand.u32 4294901760, %v5873_v30  ;;  %v5974_v57 = vld [vmem:[#allocation6 + $0x230] sm:$0xff]  ;;  %v5992_v29 = vld [vmem:[#allocation6 + $0x2c0] sm:$0xff]  ;;  %v5994_v8 = vld [vmem:[#allocation6 + $0x2c8] sm:$0xff] }
  0xa9   :  { %774 = vmatprep.mubr.f32.mxu1 %v7633_v27  ;;  %v7635_v47 = vand.u32 4294901760, %v7584_v9  ;;  %v7640_v17 = vand.u32 4294901760, %v5932_v46  ;;  %v176_v24 = vsub.s32 4, %v7594_v4  ;;  %v7641_v9 = vand.u32 4294901760, %v7586_v45 }
  0xaa   :  { %7626 = vst [vmem:[#allocation45_spill] sm:$0xff] %v5956_v34  ;;  %7629 = vst [vmem:[#allocation46_spill] sm:$0xff] %v5964_v36  ;;  %v5971_v0 = vpack.c.bf16 %v7631_v1, %v7630_v37  ;;  %v7638_v1 = vand.u32 4294901760, %v7585_v38  ;;  %v7642_v27 = vand.u32 4294901760, %v7587_v58  ;;  %4482 = vmatpush3.bf16.msra.mxu1 %v7644_v10  ;;  %v7645_v38 = vand.u32 4294901760, %v5899_v50 }
  0xab   :  { %v5984_v11 = vpack.c.bf16 %v7635_v47, %v7634_v20  ;;  %v2016_v18 = vsub.f32 %v5932_v46, %v7640_v17  ;;  %v7649_v17 = vand.u32 4294901760, %v7588_v53  ;;  %v7651_v45 = vand.u32 4294901760, %v5472_v32  ;;  %4770 = vmatpush3.bf16.msra.mxu0 %v5956_v34  ;;  %v6064_v34 = vld [vmem:[#allocation6 + $0x250] sm:$0xff] }
  0xac   :  { %7632 = vst [vmem:[#allocation50_spill] sm:$0xff] %v5971_v0  ;;  %v5990_v37 = vpack.c.bf16 %v7638_v1, %v7637_v39  ;;  %v6004_v20 = vpack.c.bf16 %v7642_v27, %v7641_v9  ;;  %v7646_v39 = vand.u32 4294901760, %v5901_v56  ;;  %v7648_v1 = vand.u32 4294901760, %v5451_v31  ;;  %v7654_v27 = vld [vmem:[#allocation27_spill] sm:$0xff]  ;;  %4772 = vmatprep.subr.bf16.mxu0 %v5971_v0 }
  0xad   :  { %7636 = vst [vmem:[#allocation53_spill] sm:$0xff] %v5984_v11  ;;  %v7652_v58 = vand.u32 4294901760, %v5478_v44  ;;  %4484 = vmatprep.subr.bf16.mxu1 %v7654_v27  ;;  %v7372_v4 = vand.u32 4294901760, %v5974_v57  ;;  %v7655_v31 = vand.u32 4294901760, %v5536_v41  ;;  %v7656_v53 = vand.u32 4294901760, %v5545_v43  ;;  %v6048_v41 = vld [vmem:[#allocation6 + $0x2d0] sm:$0xff] }
  0xae   :  { %7639 = vst [vmem:[#allocation57_spill] sm:$0xff] %v5990_v37  ;;  %7643 = vst [vmem:[#allocation58_spill] sm:$0xff] %v6004_v20  ;;  %v6011_v47 = vpack.c.bf16 %v7646_v39, %v7645_v38  ;;  %v6017_v51 = vpack.c.bf16 %v7649_v17, %v7648_v1  ;;  %v2017_v39 = vand.u32 4294901760, %v2016_v18  ;;  %v7658_v32 = vand.u32 4294901760, %v5914_v49  ;;  %v6044_v38 = vld [vmem:[#allocation6 + $0x240] sm:$0xff]  ;;  %v6046_v18 = vld [vmem:[#allocation6 + $0x248] sm:$0xff] }
  0xaf   :  { %v6023_v9 = vpack.c.bf16 %v7652_v58, %v7651_v45  ;;  %v6033_v1 = vpack.c.bf16 %v7656_v53, %v7655_v31  ;;  %v7659_v44 = vand.u32 4294901760, %v5929_v35  ;;  %v6050_v43 = vld [vmem:[#allocation6 + $0x2d8] sm:$0xff]  ;;  %v177_v31 = vrot.slane %v7598_v12, %v176_v24  ;;  %v7661_v53 = vld [vmem:[#allocation29_spill] sm:$0xff]  ;;  %v6101_v27 = vld [vmem:[#allocation6 + $0x260] sm:$0xff] }
  0xb0   :  { %7647 = vst [vmem:[#allocation62_spill] sm:$0xff] %v6011_v47  ;;  %7650 = vst [vmem:[#allocation65_spill] sm:$0xff] %v6017_v51  ;;  %2018 = vmatprep.mubr.f32.mxu0 %v2017_v39  ;;  %4486 = vmatpush3.bf16.msra.mxu1 %v7661_v53  ;;  %v6066_v39 = vld [vmem:[#allocation6 + $0x258] sm:$0xff]  ;;  %v7665_v12 = vand.u32 4294901760, %v5992_v29  ;;  %v7666_v24 = vand.u32 4294901760, %v5994_v8  ;;  %v6079_v45 = vld [vmem:[#allocation6 + $0x2e8] sm:$0xff] }
  0xb1   :  { %7653 = vst [vmem:[#allocation70_spill] sm:$0xff] %v6023_v9  ;;  %7657 = vst [vmem:[#allocation74_spill] sm:$0xff] %v6033_v1  ;;  %v6040_v17 = vpack.c.bf16 %v7659_v44, %v7658_v32  ;;  %4774 = vmatpush3.bf16.msra.mxu0 %v6011_v47  ;;  %v7662_v32 = vld [vmem:[#allocation34_spill] sm:$0xff]  ;;  %v7663_v44 = vand.u32 4294901760, %v5976_v59  ;;  %v6081_v0 = vand.u32 4294901760, %v177_v31  ;;  %v7671_v10 = vand.u32 4294901760, %v5824_v60 }
  0xb2   :  { %4488 = vmatprep.subr.bf16.mxu1 %v7662_v32  ;;  %v6073_v47 = vpack.c.bf16 %v7666_v24, %v7665_v12  ;;  %7668 = vst [vmem:[#allocation93_spill] sm:$0xff] %v6079_v45  ;;  %v7670_v53 = vld [vmem:[#allocation42_spill] sm:$0xff]  ;;  %v7672_v24 = vld [vmem:[#allocation47_spill] sm:$0xff]  ;;  %v7674_v32 = vand.u32 4294901760, %v6046_v18  ;;  %v7701_v37 = vld [vmem:[#allocation64_spill] sm:$0xff]  ;;  %v7702_v11 = vand.u32 4294901760, %v6101_v27 }
  0xb3   :  { %7660 = vst [vmem:[#allocation77_spill] sm:$0xff] %v6040_v17  ;;  %v6060_v58 = vpack.c.bf16 %v7663_v44, %v7372_v4  ;;  %4776 = vmatprep.subr.bf16.mxu0 %v6040_v17  ;;  %v6077_v4 = vld [vmem:[#allocation6 + $0x2e0] sm:$0xff]  ;;  %7669 = vst [vmem:[#allocation99_spill] sm:$0xff] %v6081_v0  ;;  %v6089_v12 = vsub.f32 %v5824_v60, %v7671_v10  ;;  %v7673_v44 = vand.u32 4294901760, %v6044_v38  ;;  %v7676_v60 = vand.u32 4294901760, %v5826_v21  ;;  %v6144_v9 = vld [vmem:[#allocation6 + $0x2f8] sm:$0xff] }
  0xb4   :  { %7667 = vst [vmem:[#allocation81_spill] sm:$0xff] %v6073_v47  ;;  %4490 = vmatpush3.bf16.msra.mxu1 %v7670_v53  ;;  %v7679_v17 = vand.u32 4294901760, %v6048_v41  ;;  %v7680_v53 = vand.u32 4294901760, %v6050_v43  ;;  %v7703_v36 = vand.u32 4294901760, %v6103_v3  ;;  %v7708_v51 = vand.u32 4294901760, %v5298_v6 }
  0xb5   :  { %7664 = vst [vmem:[#allocation82_spill] sm:$0xff] %v6060_v58  ;;  %4778 = vmatpush3.bf16.msra.mxu0 %v6060_v58  ;;  %4492 = vmatprep.subr.bf16.mxu1 %v7672_v24  ;;  %v6097_v54 = vpack.c.bf16 %v7674_v32, %v7673_v44  ;;  %v6108_v10 = vsub.f32 %v5826_v21, %v7676_v60  ;;  %v7677_v58 = vand.u32 4294901760, %v5830_v2  ;;  %v7678_v32 = vand.u32 4294901760, %v5840_v22 }
  0xb6   :  { %4780 = vmatprep.subr.bf16.mxu0 %v6073_v47  ;;  %v6125_v1 = vpack.c.bf16 %v7680_v53, %v7679_v17  ;;  %v7682_v21 = vand.u32 4294901760, %v5842_v19  ;;  %v6142_v47 = vld [vmem:[#allocation6 + $0x2f0] sm:$0xff]  ;;  %v6147_v17 = vsub.f32 %v177_v31, %v6081_v0  ;;  %v7691_v31 = vld [vmem:[#allocation59_spill] sm:$0xff]  ;;  %v7692_v0 = vand.u32 4294901760, %v6077_v4 }
  0xb7   :  { %7675 = vst [vmem:[#allocation100_spill] sm:$0xff] %v6097_v54  ;;  %v6113_v24 = vsub.f32 %v5830_v2, %v7677_v58  ;;  %v6118_v44 = vsub.f32 %v5840_v22, %v7678_v32  ;;  %v7683_v2 = vand.u32 4294901760, %v5844_v25  ;;  %v7684_v22 = vand.u32 4294901760, %v5869_v16 }
  0xb8   :  { %7681 = vst [vmem:[#allocation101_spill] sm:$0xff] %v6125_v1  ;;  %v6130_v60 = vsub.f32 %v5842_v19, %v7682_v21  ;;  %7685 = vst [vmem:[#allocation102_spill] sm:$0xff] %v6147_v17  ;;  %v7686_v19 = vand.u32 4294901760, %v5871_v61  ;;  %v7687_v21 = vld [vmem:[#allocation52_spill] sm:$0xff] }
  0xb9   :  { %v6135_v58 = vsub.f32 %v5844_v25, %v7683_v2  ;;  %v6140_v32 = vsub.f32 %v5869_v16, %v7684_v22  ;;  %4494 = vmatpush3.bf16.msra.mxu1 %v7687_v21  ;;  %v7688_v25 = vand.u32 4294901760, %v6064_v34  ;;  %v7689_v2 = vand.u32 4294901760, %v6066_v39  ;;  %4782 = vmatpush3.bf16.msra.mxu0 %v6097_v54  ;;  %v6180_v54 = vld [vmem:[#allocation6 + $0x270] sm:$0xff] }
  0xba   :  { %v6152_v53 = vsub.f32 %v5871_v61, %v7686_v19  ;;  %4496 = vmatprep.subr.bf16.mxu1 %v7691_v31  ;;  %v7693_v61 = vand.u32 4294901760, %v6079_v45  ;;  %v7695_v21 = vand.u32 4294901760, %v5268_v33  ;;  %4784 = vmatprep.subr.bf16.mxu0 %v6125_v1  ;;  %v6182_v31 = vld [vmem:[#allocation6 + $0x278] sm:$0xff] }
  0xbb   :  { %v6159_v16 = vpack.c.bf16 %v7689_v2, %v7688_v25  ;;  %v7696_v25 = vand.u32 4294901760, %v5271_v40  ;;  %7697 = vst [vmem:[#allocation105_spill] sm:$0xff] %v6182_v31 }
  0xbc   :  { %v6169_v19 = vpack.c.bf16 %v7693_v61, %v7692_v0  ;;  %v1283_v20 = vsub.f32 %v5268_v33, %v7695_v21  ;;  %v7698_v0 = vand.u32 4294901760, %v5279_v48  ;;  %v7699_v33 = vand.u32 4294901760, %v5286_v52 }
  0xbd   :  { %7690 = vst [vmem:[#allocation103_spill] sm:$0xff] %v6159_v16  ;;  %v1290_v2 = vsub.f32 %v5271_v40, %v7696_v25  ;;  %v7700_v40 = vand.u32 4294901760, %v5873_v30  ;;  %4498 = vmatpush3.bf16.msra.mxu1 %v7701_v37  ;;  %4786 = vmatpush3.bf16.msra.mxu0 %v6159_v16  ;;  %v7717_v16 = vld [vmem:[#allocation76_spill] sm:$0xff] }
  0xbe   :  { %7694 = vst [vmem:[#allocation104_spill] sm:$0xff] %v6169_v19  ;;  %v1171_v61 = vsub.f32 %v5279_v48, %v7698_v0  ;;  %v1178_v21 = vsub.f32 %v5286_v52, %v7699_v33  ;;  %v1284_v22 = vand.u32 4294901760, %v1283_v20  ;;  %v6201_v48 = vpack.c.bf16 %v7703_v36, %v7702_v11  ;;  %4788 = vmatprep.subr.bf16.mxu0 %v6169_v19 }
  0xbf   :  { %v6193_v25 = vsub.f32 %v5873_v30, %v7700_v40  ;;  %v1291_v1 = vand.u32 4294901760, %v1290_v2  ;;  %v7705_v52 = vand.u32 4294901760, %v5294_v63  ;;  %v7706_v30 = vld [vmem:[#allocation71_spill] sm:$0xff]  ;;  %v1304_v36 = vsub.f32 %v5298_v6, %v7708_v51 }
  0xc0   :  { %7704 = vst [vmem:[#allocation106_spill] sm:$0xff] %v6201_v48  ;;  %v1172_v0 = vand.u32 4294901760, %v1171_v61  ;;  %v1179_v45 = vand.u32 4294901760, %v1178_v21  ;;  %4500 = vmatprep.subr.bf16.mxu1 %v7706_v30  ;;  %v7709_v11 = vand.u32 4294901760, %v5875_v5  ;;  %v7711_v21 = vand.u32 4294901760, %v6144_v9 }
  0xc1   :  { %v1297_v33 = vsub.f32 %v5294_v63, %v7705_v52  ;;  %v6210_v40 = vpack.c.bf16 %v1291_v1, %v1284_v22  ;;  %v7710_v63 = vand.u32 4294901760, %v6142_v47  ;;  %v7714_v22 = vand.u32 4294901760, %v6147_v17  ;;  %4502 = vmatpush3.bf16.msra.mxu1 %v7717_v16  ;;  %4790 = vmatpush3.bf16.msra.mxu0 %v6201_v48 }
  0xc2   :  { %v6218_v61 = vsub.f32 %v5875_v5, %v7709_v11  ;;  %v6227_v2 = vpack.c.bf16 %v1179_v45, %v1172_v0  ;;  %v1305_v51 = vand.u32 4294901760, %v1304_v36  ;;  %v7715_v20 = vand.u32 4294901760, %v5309_v14  ;;  %v7719_v45 = vld [vmem:[#allocation17_spill] sm:$0xff]  ;;  %v7723_v36 = vld [vmem:[#allocation32_spill] sm:$0xff] }
  0xc3   :  { %7707 = vst [vmem:[#allocation107_spill] sm:$0xff] %v6210_v40  ;;  %v6225_v52 = vpack.c.bf16 %v7711_v21, %v7710_v63  ;;  %v1298_v1 = vand.u32 4294901760, %v1297_v33  ;;  %v2022_v6 = vsub.f32 %v6147_v17, %v7714_v22  ;;  %v7716_v11 = vand.u32 4294901760, %v5311_v15  ;;  %v7721_v21 = vld [vmem:[#allocation31_spill] sm:$0xff] }
  0xc4   :  { %7713 = vst [vmem:[#allocation109_spill] sm:$0xff] %v6227_v2  ;;  %v1185_v5 = vsub.f32 %v5309_v14, %v7715_v20  ;;  %v7718_v63 = vand.u32 4294901760, %v7565_v26  ;;  %v7720_v0 = vand.u32 4294901760, %v7719_v45  ;;  %v7722_v2 = vand.u32 4294901760, %v7721_v21  ;;  %v7725_v14 = vld [vmem:[#allocation36_spill] sm:$0xff] }
  0xc5   :  { %7712 = vst [vmem:[#allocation108_spill] sm:$0xff] %v6225_v52  ;;  %v1192_v19 = vsub.f32 %v5311_v15, %v7716_v11  ;;  %v7724_v40 = vand.u32 4294901760, %v7723_v36  ;;  %v7726_v20 = vand.u32 4294901760, %v7725_v14  ;;  %v7727_v15 = vld [vmem:[#allocation83_spill] sm:$0xff]  ;;  %v7728_v26 = vand.u32 4294901760, %v6180_v54  ;;  %4792 = vmatprep.subr.bf16.mxu0 %v6225_v52  ;;  %v7740_v52 = vld [vmem:[#allocation41_spill] sm:$0xff] }
  0xc6   :  { %v4507_v33 = vpack.c.bf16 %v7720_v0, %v7718_v63  ;;  %v1311_v22 = vsub.f32 %v7721_v21, %v7722_v2  ;;  %4504 = vmatprep.subr.bf16.mxu1 %v7727_v15  ;;  %v7729_v11 = vand.u32 4294901760, %v6182_v31  ;;  %v6260_v45 = vpack.c.bf16 %v1305_v51, %v1298_v1  ;;  %v7732_v21 = vld [vmem:[#allocation18_spill] sm:$0xff] }
  0xc7   :  { %v1318_v30 = vsub.f32 %v7723_v36, %v7724_v40  ;;  %v1199_v37 = vsub.f32 %v7725_v14, %v7726_v20  ;;  %v1186_v2 = vand.u32 4294901760, %v1185_v5  ;;  %v1193_v0 = vand.u32 4294901760, %v1192_v19  ;;  %v7734_v14 = vld [vmem:[#allocation20_spill] sm:$0xff]  ;;  %v7736_v1 = vld [vmem:[#allocation38_spill] sm:$0xff]  ;;  %v7738_v5 = vld [vmem:[#allocation87_spill] sm:$0xff] }
  0xc8   :  { %v6258_v63 = vpack.c.bf16 %v7729_v11, %v7728_v26  ;;  %7731 = vst [vmem:[#allocation31_spill] sm:$0xff] %v6260_v45  ;;  %v4827_v40 = vpack.c.bf16 %v6108_v10, %v6089_v12  ;;  %v7733_v36 = vand.u32 4294901760, %v7732_v21  ;;  %v7735_v20 = vand.u32 4294901760, %v7734_v14  ;;  %4506 = vmatpush3.bf16.msra.mxu1 %v7738_v5  ;;  %v7742_v14 = vld [vmem:[#allocation44_spill] sm:$0xff] }
  0xc9   :  { %v1312_v15 = vand.u32 4294901760, %v1311_v22  ;;  %v1319_v16 = vand.u32 4294901760, %v1318_v30  ;;  %v2023_v17 = vand.u32 4294901760, %v2022_v6  ;;  %v6269_v31 = vpack.c.bf16 %v1193_v0, %v1186_v2  ;;  %v7744_v6 = vld [vmem:[#allocation48_spill] sm:$0xff]  ;;  %4508 = vmatprep.subr.bf16.mxu1 %v4507_v33 }
  0xca   :  { %7730 = vst [vmem:[#allocation17_spill] sm:$0xff] %v6258_v63  ;;  %v4509_v48 = vpack.c.bf16 %v7735_v20, %v7733_v36  ;;  %v1200_v26 = vand.u32 4294901760, %v1199_v37  ;;  %v7737_v51 = vand.u32 4294901760, %v7736_v1  ;;  %v7741_v45 = vand.u32 4294901760, %v7740_v52  ;;  %4794 = vmatpush3.bf16.msra.mxu0 %v6258_v63  ;;  %v7748_v0 = vld [vmem:[#allocation24_spill] sm:$0xff] }
  0xcb   :  { %v6275_v11 = vpack.c.bf16 %v1319_v16, %v1312_v15  ;;  %v7743_v36 = vand.u32 4294901760, %v7742_v14  ;;  %v7745_v22 = vand.u32 4294901760, %v7744_v6  ;;  %v4829_v2 = vpack.c.bf16 %v6118_v44, %v6113_v24  ;;  %v7746_v16 = vld [vmem:[#allocation23_spill] sm:$0xff]  ;;  %4828 = vmatprep.subr.bf16.mxu0 %v4827_v40 }
  0xcc   :  { %v1206_v19 = vsub.f32 %v7736_v1, %v7737_v51  ;;  %v1325_v21 = vsub.f32 %v7740_v52, %v7741_v45  ;;  %v7747_v15 = vand.u32 4294901760, %v7746_v16  ;;  %v7749_v20 = vand.u32 4294901760, %v7748_v0  ;;  %v7754_v16 = vld [vmem:[#allocation54_spill] sm:$0xff] }
  0xcd   :  { %7739 = vst [vmem:[#allocation32_spill] sm:$0xff] %v6275_v11  ;;  %v1332_v30 = vsub.f32 %v7742_v14, %v7743_v36  ;;  %v1213_v37 = vsub.f32 %v7744_v6, %v7745_v22  ;;  %v4831_v52 = vpack.c.bf16 %v6135_v58, %v6130_v60  ;;  %v7750_v6 = vld [vmem:[#allocation49_spill] sm:$0xff]  ;;  %v7752_v63 = vand.u32 4294901760, %v7615_v7  ;;  %2024 = vmatmul.mubr.f32.vlgmr.msra.gmra.mrb[6].mxu0 %v2023_v17 }
  0xce   :  { %v4511_v1 = vpack.c.bf16 %v7749_v20, %v7747_v15  ;;  %v1207_v45 = vand.u32 4294901760, %v1206_v19  ;;  %v1326_v51 = vand.u32 4294901760, %v1325_v21  ;;  %v7751_v22 = vand.u32 4294901760, %v7750_v6  ;;  %4830 = vmatpush3.bf16.msra.mxu0 %v4829_v2  ;;  %2391 = vmatprep.mubr.f32.mxu0 %v5932_v46 }
  0xcf   :  { %v1333_v14 = vand.u32 4294901760, %v1332_v30  ;;  %v1214_v36 = vand.u32 4294901760, %v1213_v37  ;;  %778 = vmatmul.mubr.f32.vlgmr.msra.gmra.mrb[6].mxu1 %v7752_v63  ;;  %v7755_v0 = vand.u32 4294901760, %v7754_v16  ;;  %v7756_v20 = vand.u32 4294901760, %v5899_v50  ;;  %v7758_v30 = vld [vmem:[#allocation55_spill] sm:$0xff]  ;;  %4832 = vmatprep.subr.bf16.mxu0 %v4831_v52 }
  0xd0   :  { %v1220_v33 = vsub.f32 %v7750_v6, %v7751_v22  ;;  %v6300_v11 = vpack.c.bf16 %v1207_v45, %v1200_v26  ;;  %4510 = vmatpush3.bf16.msra.mxu1 %v4509_v48  ;;  %v7759_v37 = vand.u32 4294901760, %v7758_v30  ;;  %v7760_v63 = vand.u32 4294901760, %v5901_v56 }
  0xd1   :  { %v1339_v15 = vsub.f32 %v7754_v16, %v7755_v0  ;;  %v6308_v40 = vsub.f32 %v5899_v50, %v7756_v20  ;;  %v6310_v19 = vpack.c.bf16 %v1333_v14, %v1326_v51  ;;  %v7761_v45 = vand.u32 4294901760, %v5914_v49  ;;  %4512 = vmatprep.subr.bf16.mxu1 %v4511_v1  ;;  %v7763_v14 = vld [vmem:[#allocation91_spill] sm:$0xff] }
  0xd2   :  { %7753 = vst [vmem:[#allocation36_spill] sm:$0xff] %v6300_v11  ;;  %v1221_v21 = vand.u32 4294901760, %v1220_v33  ;;  %v1346_v7 = vsub.f32 %v7758_v30, %v7759_v37  ;;  %v6318_v26 = vsub.f32 %v5901_v56, %v7760_v63  ;;  %v4833_v50 = vpack.c.bf16 %v6152_v53, %v6140_v32  ;;  %944 = vmatprep.mubr.f32.mxu1 %v7763_v14 }
  0xd3   :  { %7757 = vst [vmem:[#allocation18_spill] sm:$0xff] %v6310_v19  ;;  %v6323_v6 = vsub.f32 %v5914_v49, %v7761_v45  ;;  %v1340_v17 = vand.u32 4294901760, %v1339_v15  ;;  %v7762_v48 = vand.u32 4294901760, %v5929_v35  ;;  %v4835_v56 = vpack.c.bf16 %v6218_v61, %v6193_v25  ;;  %v7777_v45 = vld [vmem:[#allocation93_spill] sm:$0xff] }
  0xd4   :  { %v6335_v22 = vpack.c.bf16 %v1221_v21, %v1214_v36  ;;  %v1347_v49 = vand.u32 4294901760, %v1346_v7  ;;  %4514 = vmatpush3.bf16.msra.mxu1 %v5894_v28  ;;  %v7766_v1 = vand.u32 4294901760, %v5974_v57  ;;  %v7767_v52 = vand.u32 4294901760, %v5976_v59  ;;  %4834 = vmatpush3.bf16.msra.mxu0 %v4833_v50 }
  0xd5   :  { %v6330_v51 = vsub.f32 %v5929_v35, %v7762_v48  ;;  %4516 = vmatprep.subr.bf16.mxu1 %v5909_v13  ;;  %v4837_v36 = vpack.c.bf16 %v6318_v26, %v6308_v40  ;;  %v7768_v28 = vand.u32 4294901760, %v5992_v29  ;;  %v7769_v0 = vand.u32 4294901760, %v5994_v8  ;;  %4836 = vmatprep.subr.bf16.mxu0 %v4835_v56 }
  0xd6   :  { %7764 = vst [vmem:[#allocation20_spill] sm:$0xff] %v6335_v22  ;;  %v6339_v2 = vpack.c.bf16 %v1347_v49, %v1340_v17  ;;  %v6344_v35 = vsub.f32 %v5974_v57, %v7766_v1  ;;  %v6349_v33 = vsub.f32 %v5976_v59, %v7767_v52  ;;  %v7770_v13 = vand.u32 4294901760, %v6044_v38  ;;  %v7779_v17 = vld [vmem:[#allocation46_spill] sm:$0xff]  ;;  %v7784_v49 = vld [vmem:[#allocation53_spill] sm:$0xff] }
  0xd7   :  { %v6357_v16 = vsub.f32 %v5992_v29, %v7768_v28  ;;  %v6362_v57 = vsub.f32 %v5994_v8, %v7769_v0  ;;  %v4839_v59 = vpack.c.bf16 %v6330_v51, %v6323_v6  ;;  %v7771_v20 = vand.u32 4294901760, %v6046_v18 }
  0xd8   :  { %7765 = vst [vmem:[#allocation38_spill] sm:$0xff] %v6339_v2  ;;  %4518 = vmatpush3.bf16.msra.mxu1 %v5920_v62  ;;  %v6370_v15 = vsub.f32 %v6044_v38, %v7770_v13  ;;  %4838 = vmatpush3.bf16.msra.mxu0 %v4837_v36  ;;  %v4841_v8 = vpack.c.bf16 %v6349_v33, %v6344_v35  ;;  %v7772_v21 = vand.u32 4294901760, %v6048_v41  ;;  %v7773_v30 = vand.u32 4294901760, %v6050_v43  ;;  %v7791_v13 = vld [vmem:[#allocation57_spill] sm:$0xff] }
  0xd9   :  { %v6375_v29 = vsub.f32 %v6046_v18, %v7771_v20  ;;  %4520 = vmatprep.subr.bf16.mxu1 %v5926_v42  ;;  %4840 = vmatprep.subr.bf16.mxu0 %v4839_v59  ;;  %v4843_v18 = vpack.c.bf16 %v6362_v57, %v6357_v16  ;;  %v7774_v42 = vand.u32 4294901760, %v6064_v34  ;;  %v7775_v7 = vand.u32 4294901760, %v6066_v39  ;;  %v7792_v20 = vld [vmem:[#allocation105_spill] sm:$0xff] }
  0xda   :  { %v6383_v62 = vsub.f32 %v6048_v41, %v7772_v21  ;;  %v6388_v38 = vsub.f32 %v6050_v43, %v7773_v30  ;;  %v7776_v63 = vand.u32 4294901760, %v6077_v4  ;;  %v7778_v50 = vand.u32 4294901760, %v7777_v45  ;;  %v7795_v21 = vld [vmem:[#allocation58_spill] sm:$0xff] }
  0xdb   :  { %v6396_v37 = vsub.f32 %v6064_v34, %v7774_v42  ;;  %v6401_v41 = vsub.f32 %v6066_v39, %v7775_v7  ;;  %v4845_v43 = vpack.c.bf16 %v6375_v29, %v6370_v15  ;;  %v7782_v56 = vand.u32 4294901760, %v6103_v3 }
  0xdc   :  { %4522 = vmatpush3.bf16.msra.mxu1 %v5938_v23  ;;  %4842 = vmatpush3.bf16.msra.mxu0 %v4841_v8  ;;  %v6409_v23 = vsub.f32 %v6077_v4, %v7776_v63  ;;  %v6414_v34 = vsub.f32 %v7777_v45, %v7778_v50  ;;  %v4847_v39 = vpack.c.bf16 %v6388_v38, %v6383_v62  ;;  %v7785_v52 = vand.u32 4294901760, %v6142_v47  ;;  %v7797_v63 = vld [vmem:[#allocation70_spill] sm:$0xff] }
  0xdd   :  { %4524 = vmatprep.subr.bf16.mxu1 %v5948_v55  ;;  %4844 = vmatprep.subr.bf16.mxu0 %v4843_v18  ;;  %v7780_v55 = vand.u32 4294901760, %v6101_v27  ;;  %v6427_v4 = vsub.f32 %v6103_v3, %v7782_v56  ;;  %v4849_v1 = vpack.c.bf16 %v6401_v41, %v6396_v37  ;;  %v7787_v28 = vand.u32 4294901760, %v6144_v9 }
  0xde   :  { %v6435_v36 = vsub.f32 %v6142_v47, %v7785_v52  ;;  %v4851_v3 = vpack.c.bf16 %v6414_v34, %v6409_v23  ;;  %v7789_v0 = vand.u32 4294901760, %v6180_v54  ;;  %v7793_v8 = vand.u32 4294901760, %v7792_v20 }
  0xdf   :  { %v6422_v48 = vsub.f32 %v6101_v27, %v7780_v55  ;;  %7783 = vst [vmem:[#allocation41_spill] sm:$0xff] %v6427_v4  ;;  %v6440_v27 = vsub.f32 %v6144_v9, %v7787_v28  ;;  %v2144_v30 = vand.u32 4294901760, %v6089_v12  ;;  %v2151_v18 = vand.u32 4294901760, %v6108_v10  ;;  %v7801_v28 = vld [vmem:[#allocation16_spill] sm:$0xff] }
  0xe0   :  { %4526 = vmatpush3.bf16.msra.mxu1 %v7779_v17  ;;  %4846 = vmatpush3.bf16.msra.mxu0 %v4845_v43  ;;  %7786 = vst [vmem:[#allocation44_spill] sm:$0xff] %v6435_v36  ;;  %v6447_v59 = vsub.f32 %v6180_v54, %v7789_v0  ;;  %v6453_v47 = vsub.f32 %v7792_v20, %v7793_v8  ;;  %v2032_v42 = vand.u32 4294901760, %v6113_v24  ;;  %v2039_v7 = vand.u32 4294901760, %v6118_v44  ;;  %v7796_v43 = vld [vmem:[#allocation65_spill] sm:$0xff]  ;;  %v7798_v0 = vld [vmem:[#allocation74_spill] sm:$0xff]  ;;  %v7800_v8 = vld [vmem:[#allocation92_spill] sm:$0xff] }
  0xe1   :  { %7781 = vst [vmem:[#allocation87_spill] sm:$0xff] %v6422_v48  ;;  %4528 = vmatprep.subr.bf16.mxu1 %v7784_v49  ;;  %7788 = vst [vmem:[#allocation48_spill] sm:$0xff] %v6440_v27  ;;  %4848 = vmatprep.subr.bf16.mxu0 %v4847_v39  ;;  %v4853_v9 = vpack.c.bf16 %v6427_v4, %v6422_v48  ;;  %v4855_v54 = vpack.c.bf16 %v6440_v27, %v6435_v36  ;;  %v2158_v39 = vand.u32 4294901760, %v6130_v60 }
  0xe2   :  { %7790 = vst [vmem:[#allocation23_spill] sm:$0xff] %v6447_v59  ;;  %7794 = vst [vmem:[#allocation24_spill] sm:$0xff] %v6453_v47  ;;  %v4857_v45 = vpack.c.bf16 %v6453_v47, %v6447_v59  ;;  %v4891_v50 = vpack.c.bf16 %v2151_v18, %v2144_v30  ;;  %v4893_v17 = vpack.c.bf16 %v2039_v7, %v2032_v42  ;;  %v2165_v55 = vand.u32 4294901760, %v6135_v58 }
  0xe3   :  { %v2046_v56 = vand.u32 4294901760, %v6140_v32  ;;  %v2053_v49 = vand.u32 4294901760, %v6152_v53  ;;  %v2179_v52 = vand.u32 4294901760, %v6218_v61  ;;  %v7807_v20 = vand.u32 4294901760, %v6344_v35 }
  0xe4   :  { %4530 = vmatpush3.bf16.msra.mxu1 %v7791_v13  ;;  %4850 = vmatpush3.bf16.msra.mxu0 %v4849_v1  ;;  %v2172_v1 = vand.u32 4294901760, %v6193_v25  ;;  %v7808_v46 = vand.u32 4294901760, %v6349_v33  ;;  %v7811_v22 = vand.u32 4294901760, %v6362_v57  ;;  %v2166_v11 = vsub.f32 %v6135_v58, %v2165_v55 }
  0xe5   :  { %4532 = vmatprep.subr.bf16.mxu1 %v7795_v21  ;;  %4852 = vmatprep.subr.bf16.mxu0 %v4851_v3  ;;  %v4897_v21 = vpack.c.bf16 %v2053_v49, %v2046_v56  ;;  %v7806_v3 = vand.u32 4294901760, %v6330_v51 }
  0xe6   :  { %v6503_v2 = vpack.c.bf16 %v7808_v46, %v7807_v20  ;;  %v7815_v20 = vand.u32 4294901760, %v6388_v38  ;;  %v2152_v46 = vsub.f32 %v6108_v10, %v2151_v18  ;;  %v2054_v10 = vsub.f32 %v6152_v53, %v2053_v49 }
  0xe7   :  { %v2167_v18 = vand.u32 4294901760, %v2166_v11  ;;  %v2173_v58 = vsub.f32 %v6193_v25, %v2172_v1  ;;  %v7820_v53 = vand.u32 4294901760, %v6308_v40  ;;  %v7821_v11 = vand.u32 4294901760, %v6318_v26 }
  0xe8   :  { %4534 = vmatpush3.bf16.msra.mxu1 %v7796_v43  ;;  %4854 = vmatpush3.bf16.msra.mxu0 %v4853_v9  ;;  %v7799_v9 = vld [vmem:[#allocation13_spill] sm:$0xff]  ;;  %v7803_v43 = vand.u32 4294901760, %v6308_v40 }
  0xe9   :  { %4536 = vmatprep.subr.bf16.mxu1 %v7797_v63  ;;  %4856 = vmatprep.subr.bf16.mxu0 %v4855_v54  ;;  %v7804_v63 = vand.u32 4294901760, %v6318_v26  ;;  %v2068_v49 = vsub.f32 %v6318_v26, %v7821_v11  ;;  %v7825_v26 = vand.u32 4294901760, %v6344_v35  ;;  %v7835_v11 = vand.u32 4294901760, %v6396_v37 }
  0xeb   :  { %v4901_v54 = vpack.c.bf16 %v7804_v63, %v7803_v43  ;;  %v7812_v43 = vand.u32 4294901760, %v6370_v15  ;;  %v7813_v63 = vand.u32 4294901760, %v6375_v29 }
  0xec   :  { %4538 = vmatpush3.bf16.msra.mxu1 %v7798_v0  ;;  %4858 = vmatpush3.bf16.msra.mxu0 %v4857_v45  ;;  %v4895_v0 = vpack.c.bf16 %v2165_v55, %v2158_v39  ;;  %v4899_v45 = vpack.c.bf16 %v2179_v52, %v2172_v1 }
  0xed   :  { %4540 = vmatprep.subr.bf16.mxu1 %v7799_v9  ;;  %4892 = vmatprep.subr.bf16.mxu0 %v4891_v50  ;;  %v7802_v9 = vld [vmem:[#allocation102_spill] sm:$0xff]  ;;  %v7805_v50 = vand.u32 4294901760, %v6323_v6 }
  0xef   :  { %946 = vmatmul.mubr.f32.vlgmr.msra.gmra.mrb[8].mxu1 %v7800_v8  ;;  %2394 = vmatmul.mubr.f32.vlgmr.msra.gmra.mrb[8].mxu0 %v7802_v9  ;;  %v4903_v13 = vpack.c.bf16 %v7806_v3, %v7805_v50  ;;  %v7810_v9 = vand.u32 4294901760, %v6357_v16  ;;  %v6516_v3 = vpack.c.bf16 %v7813_v63, %v7812_v43  ;;  %v7816_v63 = vld [vmem:[#allocation39_spill] sm:$0xff]  ;;  %v2033_v50 = vsub.f32 %v6113_v24, %v2032_v42 }
  0xf0   :  { %4542 = vmatpush3.bf16.msra.mxu1 %v7801_v28  ;;  %4894 = vmatpush3.bf16.msra.mxu0 %v4893_v17  ;;  %v7809_v28 = vld [vmem:[#allocation21_spill] sm:$0xff]  ;;  %v7814_v17 = vand.u32 4294901760, %v6383_v62  ;;  %v7818_v43 = vld [vmem:[#allocation27_spill] sm:$0xff] }
  0xf1   :  { %4544 = vmatprep.subr.bf16.mxu1 %v7809_v28  ;;  %v6510_v19 = vpack.c.bf16 %v7811_v22, %v7810_v9  ;;  %4896 = vmatprep.subr.bf16.mxu0 %v4895_v0  ;;  %v2145_v0 = vsub.f32 %v6089_v12, %v2144_v30  ;;  %v2159_v9 = vsub.f32 %v6130_v60, %v2158_v39  ;;  %v2034_v12 = vand.u32 4294901760, %v2033_v50 }
  0xf2   :  { %v6524_v28 = vpack.c.bf16 %v7815_v20, %v7814_v17  ;;  %1048 = vmatprep.mubr.f32.mxu1 %v7763_v14  ;;  %2668 = vmatprep.mubr.f32.mxu0 %v7816_v63  ;;  %v7817_v17 = vld [vmem:[#allocation25_spill] sm:$0xff]  ;;  %v2040_v20 = vsub.f32 %v6118_v44, %v2039_v7  ;;  %v2047_v14 = vsub.f32 %v6140_v32, %v2046_v56  ;;  %v2153_v63 = vand.u32 4294901760, %v2152_v46 }
  0xf3   :  { %v2146_v22 = vand.u32 4294901760, %v2145_v0  ;;  %v2160_v30 = vand.u32 4294901760, %v2159_v9  ;;  %v2055_v60 = vand.u32 4294901760, %v2054_v10  ;;  %v2180_v32 = vsub.f32 %v6218_v61, %v2179_v52  ;;  %v7819_v7 = vld [vmem:[#allocation29_spill] sm:$0xff]  ;;  %v7830_v10 = vld [vmem:[#allocation47_spill] sm:$0xff] }
  0xf4   :  { %4546 = vmatpush3.bf16.msra.mxu1 %v7817_v17  ;;  %4898 = vmatpush3.bf16.msra.mxu0 %v4897_v21  ;;  %v2041_v24 = vand.u32 4294901760, %v2040_v20  ;;  %v2048_v42 = vand.u32 4294901760, %v2047_v14  ;;  %v2061_v56 = vsub.f32 %v6308_v40, %v7820_v53  ;;  %v7822_v21 = vld [vmem:[#allocation34_spill] sm:$0xff]  ;;  %v2174_v61 = vand.u32 4294901760, %v2173_v58 }
  0xf5   :  { %4548 = vmatprep.subr.bf16.mxu1 %v7818_v43  ;;  %4900 = vmatprep.subr.bf16.mxu0 %v4899_v45  ;;  %v6542_v44 = vpack.c.bf16 %v2153_v63, %v2146_v22  ;;  %v6549_v55 = vpack.c.bf16 %v2167_v18, %v2160_v30  ;;  %v2181_v1 = vand.u32 4294901760, %v2180_v32  ;;  %v7823_v52 = vand.u32 4294901760, %v6323_v6  ;;  %v7828_v17 = vld [vmem:[#allocation42_spill] sm:$0xff] }
  0xf6   :  { %v6547_v39 = vpack.c.bf16 %v2041_v24, %v2034_v12  ;;  %v6558_v25 = vpack.c.bf16 %v2055_v60, %v2048_v42  ;;  %v2062_v50 = vand.u32 4294901760, %v2061_v56  ;;  %v2069_v46 = vand.u32 4294901760, %v2068_v49 }
  0xf7   :  { %v2187_v45 = vsub.f32 %v6323_v6, %v7823_v52  ;;  %v7824_v40 = vand.u32 4294901760, %v6330_v51  ;;  %v6569_v9 = vpack.c.bf16 %v2181_v1, %v2174_v61  ;;  %v7826_v63 = vand.u32 4294901760, %v6349_v33 }
  0xf8   :  { %4550 = vmatpush3.bf16.msra.mxu1 %v7819_v7  ;;  %4902 = vmatpush3.bf16.msra.mxu0 %v4901_v54  ;;  %v2075_v54 = vsub.f32 %v6344_v35, %v7825_v26  ;;  %v7827_v6 = vand.u32 4294901760, %v6357_v16  ;;  %v6578_v20 = vpack.c.bf16 %v2069_v46, %v2062_v50  ;;  %v7829_v12 = vand.u32 4294901760, %v6362_v57 }
  0xf9   :  { %4552 = vmatprep.subr.bf16.mxu1 %v7822_v21  ;;  %4904 = vmatprep.subr.bf16.mxu0 %v4903_v13  ;;  %v2194_v22 = vsub.f32 %v6330_v51, %v7824_v40  ;;  %v2188_v43 = vand.u32 4294901760, %v2187_v45  ;;  %v2082_v0 = vsub.f32 %v6349_v33, %v7826_v63  ;;  %v7831_v30 = vand.u32 4294901760, %v6370_v15 }
  0xfa   :  { %v2201_v13 = vsub.f32 %v6357_v16, %v7827_v6  ;;  %v2076_v14 = vand.u32 4294901760, %v2075_v54  ;;  %v2208_v35 = vsub.f32 %v6362_v57, %v7829_v12  ;;  %v7832_v18 = vand.u32 4294901760, %v6375_v29  ;;  %v140_v6 = vld [vmem:[#allocation6 + $0x308] sm:$0xff] }
  0xfb   :  { %v2195_v51 = vand.u32 4294901760, %v2194_v22  ;;  %v2083_v24 = vand.u32 4294901760, %v2082_v0  ;;  %v2089_v16 = vsub.f32 %v6370_v15, %v7831_v30  ;;  %v7833_v57 = vand.u32 4294901760, %v6383_v62  ;;  %v7846_v0 = vld [vmem:[#allocation64_spill] sm:$0xff]  ;;  %v141_v30 = vld [vmem:[#allocation6 + $0x310] sm:$0xff] }
  0xfc   :  { %4554 = vmatpush3.bf16.msra.mxu1 %v7828_v17  ;;  %4906 = vmatpush3.bf16.msra.mxu0 %v6503_v2  ;;  %v2202_v33 = vand.u32 4294901760, %v2201_v13  ;;  %v2096_v42 = vsub.f32 %v6375_v29, %v7832_v18  ;;  %v2209_v58 = vand.u32 4294901760, %v2208_v35  ;;  %v7834_v32 = vand.u32 4294901760, %v6388_v38  ;;  %v7848_v17 = vld [vmem:[#allocation71_spill] sm:$0xff] }
  0xfd   :  { %4556 = vmatprep.subr.bf16.mxu1 %v7830_v10  ;;  %4908 = vmatprep.subr.bf16.mxu0 %v6510_v19  ;;  %v6592_v60 = vpack.c.bf16 %v2195_v51, %v2188_v43  ;;  %v2215_v2 = vsub.f32 %v6383_v62, %v7833_v57  ;;  %v6600_v53 = vpack.c.bf16 %v2083_v24, %v2076_v14  ;;  %v2090_v15 = vand.u32 4294901760, %v2089_v16  ;;  %v7836_v19 = vld [vmem:[#allocation52_spill] sm:$0xff]  ;;  %v142_v18 = vld [vmem:[#allocation6 + $0x318] sm:$0xff] }
  0xfe   :  { %v2222_v7 = vsub.f32 %v6388_v38, %v7834_v32  ;;  %v2097_v56 = vand.u32 4294901760, %v2096_v42  ;;  %v2103_v29 = vsub.f32 %v6396_v37, %v7835_v11  ;;  %v6606_v49 = vpack.c.bf16 %v2209_v58, %v2202_v33  ;;  %v7839_v38 = vld [vmem:[#allocation59_spill] sm:$0xff]  ;;  %v7851_v16 = vld [vmem:[#allocation76_spill] sm:$0xff] }
  0xff   :  { %v2216_v21 = vand.u32 4294901760, %v2215_v2  ;;  %v7838_v62 = vand.u32 4294901760, %v6401_v41  ;;  %v7840_v52 = vmov %v7835_v11  ;;  %v7405_v46 = vand.u32 4294901760, %v6435_v36  ;;  %v7852_v42 = vld [vmem:[#allocation83_spill] sm:$0xff] }
 0x100   :  { %4558 = vmatpush3.bf16.msra.mxu1 %v7836_v19  ;;  %7837 = vst [vmem:[#allocation49_spill] sm:$0xff] %v6606_v49  ;;  %v2223_v61 = vand.u32 4294901760, %v2222_v7  ;;  %4910 = vmatpush3.bf16.msra.mxu0 %v6516_v3  ;;  %v6618_v40 = vpack.c.bf16 %v2097_v56, %v2090_v15  ;;  %v2104_v22 = vand.u32 4294901760, %v2103_v29  ;;  %v7843_v26 = vand.u32 4294901760, %v6409_v23  ;;  %v143_v7 = vld [vmem:[#allocation6 + $0x320] sm:$0xff]  ;;  %v144_v56 = vld [vmem:[#allocation6 + $0x328] sm:$0xff] }
 0x101   :  { %v2110_v1 = vsub.f32 %v6401_v41, %v7838_v62  ;;  %4560 = vmatprep.subr.bf16.mxu1 %v7839_v38  ;;  %v7841_v45 = vmov %v7838_v62  ;;  %4912 = vmatprep.subr.bf16.mxu0 %v6524_v28  ;;  %v7844_v54 = vand.u32 4294901760, %v6414_v34  ;;  %v7404_v3 = vand.u32 4294901760, %v6440_v27  ;;  %v139_v41 = vld [vmem:[#allocation6 + $0x300] sm:$0xff]  ;;  %v145_v62 = vld [vmem:[#allocation6 + $0x330] sm:$0xff] }
 0x102   :  { %v4913_v50 = vpack.c.bf16 %v7841_v45, %v7840_v52  ;;  %7842 = vst [vmem:[#allocation54_spill] sm:$0xff] %v6618_v40  ;;  %v6626_v63 = vpack.c.bf16 %v2223_v61, %v2216_v21  ;;  %v7849_v28 = vand.u32 4294901760, %v6422_v48  ;;  %v7850_v51 = vand.u32 4294901760, %v6427_v4  ;;  %v7853_v19 = vld [vmem:[#allocation107_spill] sm:$0xff]  ;;  %v7937_v4 = vld [vmem:[#allocation68_spill] sm:$0xff] }
 0x103   :  { %v4915_v43 = vpack.c.bf16 %v7844_v54, %v7843_v26  ;;  %v2111_v37 = vand.u32 4294901760, %v2110_v1  ;;  %v7403_v12 = vand.u32 4294901760, %v6447_v59  ;;  %v7402_v35 = vand.u32 4294901760, %v6453_v47  ;;  %v7855_v54 = vld [vmem:[#allocation109_spill] sm:$0xff] }
 0x104   :  { %7845 = vst [vmem:[#allocation55_spill] sm:$0xff] %v6626_v63  ;;  %4562 = vmatpush3.bf16.msra.mxu1 %v7846_v0  ;;  %4914 = vmatpush3.bf16.msra.mxu0 %v4913_v50  ;;  %v4917_v14 = vpack.c.bf16 %v7850_v51, %v7849_v28  ;;  %v4919_v10 = vpack.c.bf16 %v7404_v3, %v7405_v46  ;;  %v2780_v24 = vand.u32 4294901760, %v139_v41  ;;  %v2783_v33 = vand.u32 4294901760, %v140_v6  ;;  %v7860_v28 = vld [vmem:[#allocation61_spill] sm:$0xff]  ;;  %v7890_v63 = vld [vmem:[#allocation88_spill] sm:$0xff] }
 0x105   :  { %v6629_v13 = vpack.c.bf16 %v2111_v37, %v2104_v22  ;;  %4564 = vmatprep.subr.bf16.mxu1 %v7848_v17  ;;  %4916 = vmatprep.subr.bf16.mxu0 %v4915_v43  ;;  %v4921_v58 = vpack.c.bf16 %v7402_v35, %v7403_v12  ;;  %v2786_v32 = vand.u32 4294901760, %v141_v30  ;;  %v2789_v15 = vand.u32 4294901760, %v142_v18  ;;  %v146_v22 = vld [vmem:[#allocation6 + $0x338] sm:$0xff]  ;;  %v7892_v47 = vld [vmem:[#allocation89_spill] sm:$0xff] }
 0x106   :  { %v6648_v57 = vsub.f32 %v139_v41, %v2780_v24  ;;  %v6650_v2 = vsub.f32 %v140_v6, %v2783_v33  ;;  %v6653_v11 = vpack.c.bf16 %v2783_v33, %v2780_v24  ;;  %v2792_v61 = vand.u32 4294901760, %v143_v7  ;;  %v7856_v43 = vld [vmem:[#allocation99_spill] sm:$0xff]  ;;  %v7858_v41 = vld [vmem:[#allocation60_spill] sm:$0xff]  ;;  %v153_v59 = vld [vmem:[#allocation6 + $0x370] sm:$0xff] }
 0x107   :  { %7847 = vst [vmem:[#allocation91_spill] sm:$0xff] %v6629_v13  ;;  %v6655_v29 = vsub.f32 %v141_v30, %v2786_v32  ;;  %v6658_v21 = vsub.f32 %v142_v18, %v2789_v15  ;;  %v7412_v52 = vmov 0.0|0.0   ;;  %v2795_v45 = vand.u32 4294901760, %v144_v56  ;;  %v148_v24 = vld [vmem:[#allocation6 + $0x348] sm:$0xff] }
 0x108   :  { %4566 = vmatpush3.bf16.msra.mxu1 %v7851_v16  ;;  %4918 = vmatpush3.bf16.msra.mxu0 %v4917_v14  ;;  %v7411_v1 = vand.u32 4294901760, %v6648_v57  ;;  %v7410_v38 = vand.u32 4294901760, %v6650_v2  ;;  %v6666_v50 = vsub.f32 %v143_v7, %v2792_v61  ;;  %v2798_v0 = vand.u32 4294901760, %v145_v62  ;;  %v7864_v7 = vld [vmem:[#allocation67_spill] sm:$0xff]  ;;  %v152_v13 = vld [vmem:[#allocation6 + $0x368] sm:$0xff] }
 0x109   :  { %4568 = vmatprep.subr.bf16.mxu1 %v7852_v42  ;;  %4920 = vmatprep.subr.bf16.mxu0 %v4919_v10  ;;  %v6676_v37 = vsub.f32 %v144_v56, %v2795_v45  ;;  %v7859_v6 = vand.u32 4294901760, %v7858_v41  ;;  %v7861_v51 = vand.u32 4294901760, %v7860_v28  ;;  %v147_v10 = vld [vmem:[#allocation6 + $0x340] sm:$0xff]  ;;  %v7409_v33 = vand.u32 4294901760, %v6655_v29  ;;  %v7862_v42 = vld [vmem:[#allocation66_spill] sm:$0xff] }
 0x10a   :  { %v6672_v26 = vpack.c.bf16 %v7410_v38, %v7411_v1  ;;  %v7408_v30 = vand.u32 4294901760, %v6658_v21  ;;  %v6689_v16 = vpack.c.bf16 %v2795_v45, %v2792_v61  ;;  %v2801_v18 = vand.u32 4294901760, %v146_v22 }
 0x10b   :  { %v1227_v17 = vsub.f32 %v7858_v41, %v7859_v6  ;;  %v1234_v14 = vsub.f32 %v7860_v28, %v7861_v51  ;;  %v7869_v28 = vld [vmem:[#allocation73_spill] sm:$0xff]  ;;  %v7406_v51 = vmov 0.0   ;;  %v7415_v35 = vand.u32 4294901760, %v6666_v50 }
 0x10c   :  { %4570 = vmatpush3.bf16.msra.mxu1 %v7738_v5  ;;  %4922 = vmatpush3.bf16.msra.mxu0 %v4921_v58  ;;  %v6664_v5 = vpack.c.bf16 %v2789_v15, %v2786_v32  ;;  %7854 = vst [vmem:[#allocation93_spill] sm:$0xff] %v6672_v26  ;;  %v7863_v58 = vand.u32 4294901760, %v7862_v42  ;;  %v7865_v15 = vand.u32 4294901760, %v7864_v7  ;;  %v7870_v61 = vand.u32 4294901760, %v7869_v28  ;;  %v7889_v26 = vld [vmem:[#allocation20_spill] sm:$0xff] }
 0x10d   :  { %4604 = vmatprep.subr.bf16.mxu1 %v7853_v19  ;;  %4955 = vmatprep.subr.bf16.mxu0 %v7412_v52  ;;  %v7866_v19 = vld [vmem:[#allocation94_spill] sm:$0xff]  ;;  %v7414_v12 = vand.u32 4294901760, %v6676_v37  ;;  %v6723_v3 = vpack.c.bf16 %v2801_v18, %v2798_v0 }
 0x10e   :  { %v1353_v32 = vsub.f32 %v7862_v42, %v7863_v58  ;;  %v1360_v56 = vsub.f32 %v7864_v7, %v7865_v15  ;;  %v1248_v45 = vsub.f32 %v7869_v28, %v7870_v61  ;;  %v6712_v42 = vpack.c.bf16 %v7408_v30, %v7409_v33  ;;  %v7872_v15 = vld [vmem:[#allocation12_spill] sm:$0xff]  ;;  %v149_v30 = vld [vmem:[#allocation6 + $0x350] sm:$0xff] }
 0x10f   :  { %1050 = vmatmul.mubr.f32.vlgmr.msra.gmra.mrb[10].mxu1 %v7800_v8  ;;  %2670 = vmatmul.mubr.f32.vlgmr.msra.gmra.mrb[10].mxu0 %v7856_v43  ;;  %v7857_v8 = vld [vmem:[#allocation31_spill] sm:$0xff]  ;;  %v2804_v58 = vand.u32 4294901760, %v147_v10  ;;  %v2807_v7 = vand.u32 4294901760, %v148_v24  ;;  %v1228_v28 = vand.u32 4294901760, %v1227_v17  ;;  %v1235_v61 = vand.u32 4294901760, %v1234_v14  ;;  %7874 = vst [vmem:[#allocation53_spill] sm:$0xff] %v6723_v3 }
 0x110   :  { %4606 = vmatpush3.bf16.msra.mxu1 %v7855_v54  ;;  %4957 = vmatpush3.bf16.msra.mxu0 %v6653_v11  ;;  %v6698_v54 = vsub.f32 %v145_v62, %v2798_v0  ;;  %7871 = vst [vmem:[#allocation46_spill] sm:$0xff] %v6712_v42  ;;  %v6715_v62 = vsub.f32 %v146_v22, %v2801_v18  ;;  %v1361_v22 = vand.u32 4294901760, %v1360_v56  ;;  %v7875_v33 = vld [vmem:[#allocation78_spill] sm:$0xff]  ;;  %v7878_v14 = vld [vmem:[#allocation36_spill] sm:$0xff] }
 0x111   :  { %4608 = vmatprep.subr.bf16.mxu1 %v7857_v8  ;;  %4958 = vmatprep.subr.bf16.mxu0 %v7412_v52  ;;  %v7867_v8 = vld [vmem:[#allocation72_spill] sm:$0xff]  ;;  %v7876_v38 = vand.u32 4294901760, %v7875_v33  ;;  %v6732_v17 = vpack.c.bf16 %v7414_v12, %v7415_v35  ;;  %v6735_v0 = vpack.c.bf16 %v2807_v7, %v2804_v58  ;;  %v6737_v18 = vsub.f32 %v147_v10, %v2804_v58 }
 0x112   :  { %1392 = vmatprep.mubr.f32.mxu1 %v7866_v19  ;;  %v7868_v41 = vand.u32 4294901760, %v7867_v8  ;;  %4201 = vmatprep.mubr.msk.f32.mxu0 %vm5196_vm0, %v7406_v51  ;;  %v1249_v51 = vand.u32 4294901760, %v1248_v45  ;;  %v5118_v45 = vld [vmem:[#allocation3] sm:$0xff]  ;;  %v7419_v12 = vand.u32 4294901760, %v6698_v54  ;;  %v7883_v35 = vmov 0.0|0.0  }
 0x113   :  { %7877 = vst [vmem:[#allocation57_spill] sm:$0xff] %v6732_v17  ;;  %7879 = vst [vmem:[#allocation105_spill] sm:$0xff] %v6735_v0  ;;  %v2810_v10 = vand.u32 4294901760, %v149_v30  ;;  %v7884_v17 = vld [vmem:[#allocation84_spill] sm:$0xff] }
 0x114   :  { %v1241_v6 = vsub.f32 %v7867_v8, %v7868_v41  ;;  %4610 = vmatpush3.bf16.msra.mxu1 %v6269_v31  ;;  %v184_v8 = vsub.s32 6, %v7872_v15  ;;  %4960 = vmatpush3.bf16.msra.mxu0 %v6664_v5  ;;  %v7873_v41 = vld [vmem:[#allocation32_spill] sm:$0xff]  ;;  %v1354_v31 = vand.u32 4294901760, %v1353_v32  ;;  %v150_v15 = vld [vmem:[#allocation6 + $0x358] sm:$0xff]  ;;  %v7885_v42 = vand.u32 4294901760, %v7884_v17 }
 0x115   :  { %4612 = vmatprep.subr.bf16.mxu1 %v7873_v41  ;;  %4961 = vmatprep.subr.bf16.mxu0 %v7412_v52  ;;  %v1367_v41 = vsub.f32 %v7875_v33, %v7876_v38  ;;  %v7880_v32 = vld [vmem:[#allocation79_spill] sm:$0xff]  ;;  %v7882_v38 = vld [vmem:[#allocation18_spill] sm:$0xff]  ;;  %v4621_v33 = vpack.c.bf16 %v1235_v61, %v1228_v28  ;;  %v6744_v52 = vsub.f32 %v148_v24, %v2807_v7  ;;  %v2813_v58 = vand.u32 4294901760, %v150_v15 }
 0x116   :  { %v1242_v46 = vand.u32 4294901760, %v1241_v6  ;;  %v7881_v56 = vand.u32 4294901760, %v7880_v32  ;;  %v185_v1 = vrot.slane %v5118_v45, %v184_v8  ;;  %v7886_v8 = vld [vmem:[#allocation85_spill] sm:$0xff]  ;;  %v151_v7 = vld [vmem:[#allocation6 + $0x360] sm:$0xff] }
 0x117   :  { %v1368_v24 = vand.u32 4294901760, %v1367_v41  ;;  %v6774_v41 = vsub.f32 %v150_v15, %v2813_v58  ;;  %v7901_v40 = vand.u32 4294901760, %v6744_v52 }
 0x118   :  { %4614 = vmatpush3.bf16.msra.mxu1 %v7878_v14  ;;  %v1374_v6 = vsub.f32 %v7880_v32, %v7881_v56  ;;  %4963 = vmatpush3.bf16.msra.mxu0 %v6689_v16  ;;  %v7418_v14 = vand.u32 4294901760, %v6715_v62  ;;  %v1255_v32 = vsub.f32 %v7884_v17, %v7885_v42  ;;  %v7887_v56 = vand.u32 4294901760, %v7886_v8 }
 0x119   :  { %4616 = vmatprep.subr.bf16.mxu1 %v7882_v38  ;;  %4964 = vmatprep.subr.bf16.mxu0 %v7883_v35  ;;  %v4623_v38 = vpack.c.bf16 %v1361_v22, %v1354_v31  ;;  %v4625_v28 = vpack.c.bf16 %v1249_v51, %v1242_v46  ;;  %v7891_v42 = vand.u32 4294901760, %v7890_v63  ;;  %v6768_v51 = vand.u32 4294901760, %v185_v1  ;;  %v7894_v31 = vld [vmem:[#allocation38_spill] sm:$0xff] }
 0x11a   :  { %v1262_v45 = vsub.f32 %v7886_v8, %v7887_v56  ;;  %v6759_v61 = vpack.c.bf16 %v7418_v14, %v7419_v12  ;;  %v1375_v43 = vand.u32 4294901760, %v1374_v6  ;;  %v7893_v8 = vand.u32 4294901760, %v7892_v47  ;;  %v7896_v14 = vld [vmem:[#allocation69_spill] sm:$0xff] }
 0x11b   :  { %v1381_v17 = vsub.f32 %v7890_v63, %v7891_v42  ;;  %v6772_v22 = vsub.f32 %v149_v30, %v2810_v10  ;;  %v6779_v63 = vpack.c.bf16 %v2813_v58, %v2810_v10  ;;  %v1256_v56 = vand.u32 4294901760, %v1255_v32  ;;  %v7898_v30 = vld [vmem:[#allocation98_spill] sm:$0xff] }
 0x11c   :  { %7888 = vst [vmem:[#allocation58_spill] sm:$0xff] %v6759_v61  ;;  %4618 = vmatpush3.bf16.msra.mxu1 %v7889_v26  ;;  %v1388_v46 = vsub.f32 %v7892_v47, %v7893_v8  ;;  %4966 = vmatpush3.bf16.msra.mxu0 %v6723_v3  ;;  %v1263_v47 = vand.u32 4294901760, %v1262_v45  ;;  %v2816_v42 = vand.u32 4294901760, %v151_v7  ;;  %v2819_v8 = vand.u32 4294901760, %v152_v13  ;;  %v154_v26 = vld [vmem:[#allocation6 + $0x378] sm:$0xff] }
 0x11d   :  { %4620 = vmatprep.subr.bf16.mxu1 %v7894_v31  ;;  %4967 = vmatprep.subr.bf16.mxu0 %v7883_v35  ;;  %7895 = vst [vmem:[#allocation65_spill] sm:$0xff] %v6779_v63  ;;  %v7897_v12 = vand.u32 4294901760, %v7896_v14  ;;  %v7899_v61 = vand.u32 4294901760, %v7898_v30  ;;  %v7900_v6 = vand.u32 4294901760, %v6737_v18  ;;  %v4627_v58 = vpack.c.bf16 %v1375_v43, %v1368_v24 }
 0x11e   :  { %v1382_v32 = vand.u32 4294901760, %v1381_v17  ;;  %v1389_v45 = vand.u32 4294901760, %v1388_v46  ;;  %v6794_v27 = vsub.f32 %v185_v1, %v6768_v51  ;;  %v2822_v43 = vand.u32 4294901760, %v153_v59 }
 0x11f   :  { %v1269_v31 = vsub.f32 %v7896_v14, %v7897_v12  ;;  %v1276_v15 = vsub.f32 %v7898_v30, %v7899_v61  ;;  %v6791_v10 = vpack.c.bf16 %v7901_v40, %v7900_v6  ;;  %v6797_v12 = vsub.f32 %v151_v7, %v2816_v42 }
 0x120   :  { %4622 = vmatpush3.bf16.msra.mxu1 %v4621_v33  ;;  %4969 = vmatpush3.bf16.msra.mxu0 %v6735_v0  ;;  %v6799_v14 = vsub.f32 %v152_v13, %v2819_v8  ;;  %v7427_v61 = vand.u32 4294901760, %v6772_v22  ;;  %v7426_v30 = vand.u32 4294901760, %v6774_v41  ;;  %v4629_v40 = vpack.c.bf16 %v1263_v47, %v1256_v56 }
 0x121   :  { %7902 = vst [vmem:[#allocation70_spill] sm:$0xff] %v6791_v10  ;;  %4624 = vmatprep.subr.bf16.mxu1 %v4623_v38  ;;  %4970 = vmatprep.subr.bf16.mxu0 %v7883_v35  ;;  %v2825_v33 = vand.u32 4294901760, %v154_v26  ;;  %v6804_v24 = vpack.c.bf16 %v2819_v8, %v2816_v42  ;;  %v1270_v1 = vand.u32 4294901760, %v1269_v31  ;;  %v1277_v17 = vand.u32 4294901760, %v1276_v15  ;;  %v7923_v10 = vld [vmem:[#allocation26_spill] sm:$0xff] }
 0x122   :  { %v6810_v38 = vpack.c.bf16 %v7426_v30, %v7427_v61  ;;  %v4631_v13 = vpack.c.bf16 %v1389_v45, %v1382_v32  ;;  %v6812_v7 = vsub.f32 %v153_v59, %v2822_v43  ;;  %v7424_v6 = vand.u32 4294901760, %v6794_v27 }
 0x123   :  { %7903 = vst [vmem:[#allocation74_spill] sm:$0xff] %v6804_v24  ;;  %v6814_v46 = vsub.f32 %v154_v26, %v2825_v33  ;;  %v7905_v56 = vand.u32 4294901760, %v6648_v57  ;;  %v7906_v42 = vand.u32 4294901760, %v6650_v2  ;;  %v7425_v59 = vand.u32 4294901760, %v6799_v14 }
 0x124   :  { %7904 = vst [vmem:[#allocation13_spill] sm:$0xff] %v6810_v38  ;;  %4626 = vmatpush3.bf16.msra.mxu1 %v4625_v28  ;;  %4972 = vmatpush3.bf16.msra.mxu0 %v6779_v63  ;;  %v2957_v28 = vand.u32 4294901760, %v6797_v12  ;;  %v4633_v26 = vpack.c.bf16 %v1277_v17, %v1270_v1  ;;  %v6831_v15 = vpack.c.bf16 %v2825_v33, %v2822_v43  ;;  %v7909_v32 = vand.u32 4294901760, %v6655_v29 }
 0x125   :  { %4628 = vmatprep.subr.bf16.mxu1 %v4627_v58  ;;  %v2874_v47 = vsub.f32 %v6648_v57, %v7905_v56  ;;  %v2881_v8 = vsub.f32 %v6650_v2, %v7906_v42  ;;  %4973 = vmatprep.subr.bf16.mxu0 %v7883_v35  ;;  %v2863_v58 = vsub.f32 %v6794_v27, %v7424_v6  ;;  %v7910_v56 = vand.u32 4294901760, %v6658_v21 }
 0x126   :  { %v6829_v31 = vpack.c.bf16 %v7425_v59, %v2957_v28  ;;  %7908 = vst [vmem:[#allocation16_spill] sm:$0xff] %v6831_v15  ;;  %v2888_v45 = vsub.f32 %v6655_v29, %v7909_v32  ;;  %v7428_v43 = vand.u32 4294901760, %v6814_v46  ;;  %v7912_v6 = vand.u32 4294901760, %v6666_v50 }
 0x127   :  { %v2895_v42 = vsub.f32 %v6658_v21, %v7910_v56  ;;  %v2875_v1 = vand.u32 4294901760, %v2874_v47  ;;  %v2882_v17 = vand.u32 4294901760, %v2881_v8  ;;  %v2864_v32 = vand.u32 4294901760, %v2863_v58 }
 0x128   :  { %7907 = vst [vmem:[#allocation92_spill] sm:$0xff] %v6829_v31  ;;  %4630 = vmatpush3.bf16.msra.mxu1 %v4629_v40  ;;  %4975 = vmatpush3.bf16.msra.mxu0 %v6804_v24  ;;  %v2971_v40 = vand.u32 4294901760, %v6812_v7  ;;  %v2902_v56 = vsub.f32 %v6666_v50, %v7912_v6  ;;  %v2889_v8 = vand.u32 4294901760, %v2888_v45  ;;  %v7914_v30 = vand.u32 4294901760, %v6676_v37  ;;  %v7920_v31 = vld [vmem:[#allocation95_spill] sm:$0xff]  ;;  %v7928_v24 = vld [vmem:[#allocation37_spill] sm:$0xff] }
 0x129   :  { %4632 = vmatprep.subr.bf16.mxu1 %v4631_v13  ;;  %4976 = vmatprep.subr.bf16.mxu0 %v7883_v35  ;;  %v7913_v13 = vld [vmem:[#allocation15_spill] sm:$0xff]  ;;  %v4980_v47 = vpack.c.bf16 %v2882_v17, %v2875_v1  ;;  %v2896_v59 = vand.u32 4294901760, %v2895_v42  ;;  %v7917_v6 = vand.u32 4294901760, %v6698_v54  ;;  %v7919_v17 = vand.u32 4294901760, %v6715_v62 }
 0x12a   :  { %v6848_v33 = vpack.c.bf16 %v7428_v43, %v2971_v40  ;;  %v2909_v61 = vsub.f32 %v6676_v37, %v7914_v30  ;;  %v7915_v43 = vld [vmem:[#allocation96_spill] sm:$0xff]  ;;  %v2903_v42 = vand.u32 4294901760, %v2902_v56  ;;  %v7921_v38 = vand.u32 4294901760, %v7920_v31 }
 0x12b   :  { %v2916_v58 = vsub.f32 %v6698_v54, %v7917_v6  ;;  %v4983_v45 = vpack.c.bf16 %v2896_v59, %v2889_v8  ;;  %v2923_v30 = vsub.f32 %v6715_v62, %v7919_v17  ;;  %v7926_v17 = vand.u32 4294901760, %v6744_v52 }
 0x12c   :  { %7911 = vst [vmem:[#allocation21_spill] sm:$0xff] %v6848_v33  ;;  %4634 = vmatpush3.bf16.msra.mxu1 %v4633_v26  ;;  %4978 = vmatpush3.bf16.msra.mxu0 %v6831_v15  ;;  %v7916_v26 = vld [vmem:[#allocation19_spill] sm:$0xff]  ;;  %v7918_v33 = vld [vmem:[#allocation22_spill] sm:$0xff]  ;;  %v2910_v1 = vand.u32 4294901760, %v2909_v61  ;;  %v7925_v61 = vld [vmem:[#allocation28_spill] sm:$0xff]  ;;  %v2972_v3 = vsub.f32 %v6812_v7, %v2971_v40 }
 0x12d   :  { %4668 = vmatprep.subr.bf16.mxu1 %v7913_v13  ;;  %4979 = vmatprep.subr.bf16.mxu0 %v7883_v35  ;;  %v2917_v8 = vand.u32 4294901760, %v2916_v58  ;;  %v2924_v6 = vand.u32 4294901760, %v2923_v30  ;;  %v2937_v31 = vsub.f32 %v6744_v52, %v7926_v17  ;;  %v7930_v58 = vand.u32 4294901760, %v6774_v41  ;;  %v7931_v30 = vld [vmem:[#allocation43_spill] sm:$0xff] }
 0x12e   :  { %v4986_v56 = vpack.c.bf16 %v2910_v1, %v2903_v42  ;;  %v2958_v17 = vsub.f32 %v6797_v12, %v2957_v28  ;;  %v7935_v28 = vld [vmem:[#allocation63_spill] sm:$0xff] }
 0x12f   :  { %1394 = vmatmul.mubr.f32.vlgmr.msra.gmra.mrb[12].mxu1 %v7915_v43  ;;  %4202 = vmatmul.mubr.f32.vlgmr.msra.gmra.mrb[12].mxu0 %v2864_v32  ;;  %v7922_v32 = vmov 0.0   ;;  %v4989_v63 = vpack.c.bf16 %v2924_v6, %v2917_v8  ;;  %v2951_v1 = vsub.f32 %v6774_v41, %v7930_v58  ;;  %v7934_v58 = vld [vmem:[#allocation56_spill] sm:$0xff] }
 0x130   :  { %4670 = vmatpush3.bf16.msra.mxu1 %v7916_v26  ;;  %4981 = vmatpush3.bf16.msra.mxu0 %v4980_v47  ;;  %v7924_v47 = vand.u32 4294901760, %v6737_v18  ;;  %v2959_v49 = vand.u32 4294901760, %v2958_v17  ;;  %v7938_v17 = vld [vmem:[#allocation75_spill] sm:$0xff] }
 0x131   :  { %4672 = vmatprep.subr.bf16.mxu1 %v7918_v33  ;;  %4982 = vmatprep.subr.bf16.mxu0 %v7883_v35  ;;  %v2952_v6 = vand.u32 4294901760, %v2951_v1  ;;  %v3469_v0 = vpop.f32.mrb[0].mxu1 }
 0x132   :  { %1636 = vmatprep.mubr.f32.mxu1 %v7921_v38  ;;  %4236 = vmatprep.mubr.msk.f32.mxu0 %vm5196_vm0, %v7922_v32  ;;  %v2930_v59 = vsub.f32 %v6737_v18, %v7924_v47  ;;  %v7927_v38 = vld [vmem:[#allocation30_spill] sm:$0xff]  ;;  %v2938_v47 = vand.u32 4294901760, %v2937_v31  ;;  %v7933_v31 = vand.u32 4294901760, %v6799_v14  ;;  %v3470_v36 = vpop.f32.mrb[1].mxu1 }
 0x134   :  { %4674 = vmatpush3.bf16.msra.mxu1 %v7923_v10  ;;  %4984 = vmatpush3.bf16.msra.mxu0 %v4983_v45  ;;  %v2931_v15 = vand.u32 4294901760, %v2930_v59  ;;  %v7929_v45 = vand.u32 4294901760, %v6772_v22  ;;  %v7932_v59 = vld [vmem:[#allocation51_spill] sm:$0xff] }
 0x135   :  { %4676 = vmatprep.subr.bf16.mxu1 %v7925_v61  ;;  %4985 = vmatprep.subr.bf16.mxu0 %v7883_v35 }
 0x136   :  { %v2944_v42 = vsub.f32 %v6772_v22, %v7929_v45  ;;  %v2965_v45 = vsub.f32 %v6799_v14, %v7933_v31 }
 0x138   :  { %4678 = vmatpush3.bf16.msra.mxu1 %v7927_v38  ;;  %4987 = vmatpush3.bf16.msra.mxu0 %v4986_v56  ;;  %v4992_v56 = vpack.c.bf16 %v2938_v47, %v2931_v15  ;;  %v2945_v8 = vand.u32 4294901760, %v2944_v42  ;;  %v2966_v47 = vand.u32 4294901760, %v2965_v45  ;;  %v7936_v42 = vand.u32 4294901760, %v6814_v46 }
 0x139   :  { %4680 = vmatprep.subr.bf16.mxu1 %v7928_v24  ;;  %4988 = vmatprep.subr.bf16.mxu0 %v7883_v35  ;;  %v3679_v31 = vpop.f32.mrb[0].mxu0 }
 0x13a   :  { %v4995_v15 = vpack.c.bf16 %v2952_v6, %v2945_v8  ;;  %v2979_v1 = vsub.f32 %v6814_v46, %v7936_v42  ;;  %v3680_v48 = vpop.f32.mrb[1].mxu0  ;;  %v7939_v8 = vld [vmem:[#allocation80_spill] sm:$0xff]  ;;  %v7940_v6 = vld [vmem:[#allocation86_spill] sm:$0xff] }
 0x13b   :  { %v6907_v40 = vadd.f32 %v3680_v48, %v3679_v31  ;;  %v7941_v42 = vld [vmem:[#allocation90_spill] sm:$0xff]  ;;  %v5004_v48 = vpack.c.bf16 %v6650_v2, %v6648_v57  ;;  %v5010_v57 = vpack.c.bf16 %v6676_v37, %v6666_v50  ;;  %v5013_v2 = vpack.c.bf16 %v6715_v62, %v6698_v54 }
 0x13c   :  { %4682 = vmatpush3.bf16.msra.mxu1 %v7931_v30  ;;  %4990 = vmatpush3.bf16.msra.mxu0 %v4989_v63  ;;  %v3471_v63 = vadd.f32 %v3470_v36, %v3469_v0  ;;  %v4998_v36 = vpack.c.bf16 %v2966_v47, %v2959_v49  ;;  %v2973_v0 = vand.u32 4294901760, %v2972_v3  ;;  %v7942_v49 = vld [vmem:[#allocation97_spill] sm:$0xff]  ;;  %v5019_v50 = vpack.c.bf16 %v6774_v41, %v6772_v22  ;;  %v7944_v22 = vld [vmem:[#allocation39_spill] sm:$0xff] }
 0x13d   :  { %4684 = vmatprep.subr.bf16.mxu1 %v7932_v59  ;;  %4991 = vmatprep.subr.bf16.mxu0 %v7883_v35  ;;  %v7943_v3 = vand.u32 4294901760, %v7942_v49 }
 0x140   :  { %4686 = vmatpush3.bf16.msra.mxu1 %v7934_v58  ;;  %4993 = vmatpush3.bf16.msra.mxu0 %v4992_v56  ;;  %v2980_v56 = vand.u32 4294901760, %v2979_v1  ;;  %v7960_v1 = vld [vmem:[#allocation24_spill] sm:$0xff] }
 0x141   :  { %4688 = vmatprep.subr.bf16.mxu1 %v7935_v28  ;;  %4994 = vmatprep.subr.bf16.mxu0 %v7883_v35  ;;  %v7961_v31 = vand.u32 4294901760, %v7960_v1 }
 0x142   :  { %v5001_v45 = vpack.c.bf16 %v2980_v56, %v2973_v0  ;;  %v7963_v0 = vld [vmem:[#allocation55_spill] sm:$0xff] }
 0x144   :  { %4690 = vmatpush3.bf16.msra.mxu1 %v7937_v4  ;;  %4996 = vmatpush3.bf16.msra.mxu0 %v4995_v15  ;;  %v5007_v15 = vpack.c.bf16 %v6658_v21, %v6655_v29  ;;  %v5016_v29 = vpack.c.bf16 %v6744_v52, %v6737_v18  ;;  %v156_v21 = vstv %s7124_s0  ;;  %s5198_s0 = smov [#allocation8]  }
 0x145   :  { %4692 = vmatprep.subr.bf16.mxu1 %v7938_v17  ;;  %4997 = vmatprep.subr.bf16.mxu0 %v7883_v35  ;;  %v302_v52 = vadd.f32 %v3471_v63, %v156_v21  ;;  %v7958_v63 = vld [vmem:[#allocation23_spill] sm:$0xff]  ;;  %v7965_v21 = vld [vmem:[#allocation65_spill] sm:$0xff]  ;;  %s3427_s12 = sshll.u32 %s5198_s0, 4  ;;  %s3428_s12 = int_to_ptr.vmem [resolvable:$true] %s3427_s12 }
 0x146   :  { %s5163_s13 = scalar_lea.vmem %s3428_s12, 16  ;;  %s5167_s14 = scalar_lea.vmem %s3428_s12, 32 }
 0x147   :  { %p5164_p2 = scmp.ne.s32.totalorder %s3428_s12, %s5163_s13  ;;  %p5168_p3 = scmp.lt.s32.totalorder %s3428_s12, %s3428_s12 }
 0x148   :  { %4694 = vmatpush3.bf16.msra.mxu1 %v7939_v8  ;;  %4999 = vmatpush3.bf16.msra.mxu0 %v4998_v36  ;;  %v7962_v36 = vld [vmem:[#allocation105_spill] sm:$0xff]  ;;  %p5169_p4 = scmp.lt.s32.totalorder %s5167_s14, %s5163_s13 }
 0x149   :  { %4696 = vmatprep.subr.bf16.mxu1 %v7940_v6  ;;  %5000 = vmatprep.subr.bf16.mxu0 %v7883_v35 }
 0x14a   :  { %p5170_p5 = por %p5169_p4, %p5168_p3 }
 0x14c   :  { %4698 = vmatpush3.bf16.msra.mxu1 %v7941_v42  ;;  %5002 = vmatpush3.bf16.msra.mxu0 %v5001_v45  ;;  %p5171_p6 = pnand %p5170_p5, %p5164_p2 }
 0x14d   :  { %4732 = vmatprep.subr.bf16.mxu1 %v7913_v13  ;;  %5003 = vmatprep.subr.bf16.mxu0 %v7883_v35  ;;  %v7953_v13 = vld [vmem:[#allocation44_spill] sm:$0xff] }
 0x14f   :  { %1640 = vmatmul.mubr.f32.vlgmr.msra.gmra.mrb[14].mxu1 %v7943_v3  ;;  %4237 = vmatmul.mubr.f32.vlgmr.msra.gmra.mrb[12].mxu0 %v6768_v51  ;;  %v7964_v3 = vld [vmem:[#allocation91_spill] sm:$0xff] }
 0x150   :  { %4734 = vmatpush3.bf16.msra.mxu1 %v7916_v26  ;;  %5005 = vmatpush3.bf16.msra.mxu0 %v5004_v48 }
 0x151   :  { %4736 = vmatprep.subr.bf16.mxu1 %v7918_v33  ;;  %5006 = vmatprep.subr.bf16.mxu0 %v7883_v35 }
 0x152   :  { %1910 = vmatprep.mubr.f32.mxu1 %v7866_v19  ;;  %4271 = vmatprep.mubr.msk.f32.mxu0 %vm5196_vm0, %v7922_v32 }
 0x154   :  { %4738 = vmatpush3.bf16.msra.mxu1 %v7923_v10  ;;  %5008 = vmatpush3.bf16.msra.mxu0 %v5007_v15 }
 0x155   :  { %4740 = vmatprep.subr.bf16.mxu1 %v7925_v61  ;;  %5009 = vmatprep.subr.bf16.mxu0 %v7883_v35  ;;  %v7955_v61 = vld [vmem:[#allocation48_spill] sm:$0xff] }
 0x158   :  { %4742 = vmatpush3.bf16.msra.mxu1 %v7927_v38  ;;  %5011 = vmatpush3.bf16.msra.mxu0 %v5010_v57  ;;  %v3504_v37 = vpop.f32.mrb[2].mxu1 }
 0x159   :  { %4744 = vmatprep.subr.bf16.mxu1 %v7928_v24  ;;  %5012 = vmatprep.subr.bf16.mxu0 %v7883_v35  ;;  %v3505_v19 = vpop.f32.mrb[3].mxu1  ;;  %v3749_v54 = vpop.f32.mrb[2].mxu0  ;;  %v5022_v24 = vpack.c.bf16 %v6799_v14, %v6797_v12  ;;  %v7949_v12 = vld [vmem:[#allocation41_spill] sm:$0xff] }
 0x15a   :  { %v3506_v62 = vadd.f32 %v3505_v19, %v3504_v37  ;;  %v3750_v18 = vpop.f32.mrb[3].mxu0  ;;  %v7950_v14 = vand.u32 4294901760, %v7949_v12 }
 0x15b   :  { %v6954_v10 = vadd.f32 %v3750_v18, %v3749_v54  ;;  %v7968_v18 = vld [vmem:[#allocation14_spill] sm:$0xff] }
 0x15c   :  { %4746 = vmatpush3.bf16.msra.mxu1 %v7931_v30  ;;  %5014 = vmatpush3.bf16.msra.mxu0 %v5013_v2  ;;  %v6958_v33 = vadd.f32 %v3506_v62, %v302_v52  ;;  %v7957_v30 = vld [vmem:[#allocation54_spill] sm:$0xff]  ;;  %v7967_v62 = vld [vmem:[#allocation16_spill] sm:$0xff] }
 0x15d   :  { %4748 = vmatprep.subr.bf16.mxu1 %v7932_v59  ;;  %5015 = vmatprep.subr.bf16.mxu0 %v7883_v35  ;;  %v7966_v52 = vld [vmem:[#allocation74_spill] sm:$0xff] }
 0x160   :  { %4750 = vmatpush3.bf16.msra.mxu1 %v7934_v58  ;;  %5017 = vmatpush3.bf16.msra.mxu0 %v5016_v29 }
 0x161   :  { %4752 = vmatprep.subr.bf16.mxu1 %v7935_v28  ;;  %5018 = vmatprep.subr.bf16.mxu0 %v7883_v35  ;;  %v7959_v28 = vand.u32 4294901760, %v7958_v63 }
 0x163   :  { %v2131_v47 = vsub.f32 %v7958_v63, %v7959_v28  ;;  %v7990_v63 = vld [vmem:[#allocation104_spill] sm:$0xff] }
 0x164   :  { %4754 = vmatpush3.bf16.msra.mxu1 %v7937_v4  ;;  %5020 = vmatpush3.bf16.msra.mxu0 %v5019_v50  ;;  %v5025_v4 = vpack.c.bf16 %v6814_v46, %v6812_v7  ;;  %v7951_v7 = vld [vmem:[#allocation53_spill] sm:$0xff] }
 0x165   :  { %4756 = vmatprep.subr.bf16.mxu1 %v7938_v17  ;;  %5021 = vmatprep.subr.bf16.mxu0 %v7883_v35  ;;  %v7952_v46 = vld [vmem:[#allocation49_spill] sm:$0xff]  ;;  %v2138_v17 = vsub.f32 %v7960_v1, %v7961_v31  ;;  %v2132_v2 = vand.u32 4294901760, %v2131_v47  ;;  %v7991_v1 = vld [vmem:[#allocation106_spill] sm:$0xff]  ;;  %v7992_v31 = vld [vmem:[#allocation92_spill] sm:$0xff] }
 0x167   :  { %v2139_v29 = vand.u32 4294901760, %v2138_v17  ;;  %v7993_v17 = vld [vmem:[#allocation108_spill] sm:$0xff] }
 0x168   :  { %4758 = vmatpush3.bf16.msra.mxu1 %v7939_v8  ;;  %5023 = vmatpush3.bf16.msra.mxu0 %v5022_v24  ;;  %v7969_v24 = vld [vmem:[#allocation99_spill] sm:$0xff] }
 0x169   :  { %4760 = vmatprep.subr.bf16.mxu1 %v7940_v6  ;;  %5024 = vmatprep.subr.bf16.mxu0 %v7883_v35  ;;  %v4825_v54 = vpack.c.bf16 %v2139_v29, %v2132_v2 }
 0x16c   :  { %4762 = vmatpush3.bf16.msra.mxu1 %v7941_v42  ;;  %5026 = vmatpush3.bf16.msra.mxu0 %v5025_v4  ;;  %v7970_v4 = vld [vmem:[#allocation33_spill] sm:$0xff] }
 0x16d   :  { %4796 = vmatprep.subr.bf16.mxu1 %v6542_v44  ;;  %5027 = vmatprep.subr.bf16.mxu0 %v7883_v35  ;;  %v7945_v44 = vand.u32 4294901760, %v6409_v23 }
 0x16f   :  { %1912 = vmatmul.mubr.f32.vlgmr.msra.gmra.mrb[16].mxu1 %v7915_v43  ;;  %4272 = vmatmul.mubr.f32.vlgmr.msra.gmra.mrb[12].mxu0 %v6794_v27 }
 0x170   :  { %4798 = vmatpush3.bf16.msra.mxu1 %v6547_v39  ;;  %5029 = vmatpush3.bf16.msra.mxu0 %v6653_v11  ;;  %v2229_v39 = vsub.f32 %v6409_v23, %v7945_v44  ;;  %v7972_v44 = vld [vmem:[#allocation93_spill] sm:$0xff] }
 0x171   :  { %4800 = vmatprep.subr.bf16.mxu1 %v6549_v55  ;;  %5030 = vmatprep.subr.bf16.mxu0 %v7883_v35  ;;  %v7946_v55 = vand.u32 4294901760, %v6414_v34 }
 0x172   :  { %2254 = vmatprep.mubr.f32.mxu1 %v7944_v22  ;;  %4306 = vmatprep.mubr.msk.f32.mxu0 %vm5196_vm0, %v7922_v32  ;;  %v2230_v23 = vand.u32 4294901760, %v2229_v39  ;;  %v7973_v39 = vld [vmem:[#allocation35_spill] sm:$0xff] }
 0x174   :  { %4802 = vmatpush3.bf16.msra.mxu1 %v6558_v25  ;;  %5032 = vmatpush3.bf16.msra.mxu0 %v6664_v5  ;;  %v2236_v25 = vsub.f32 %v6414_v34, %v7946_v55  ;;  %v7954_v34 = vand.u32 4294901760, %v7953_v13  ;;  %v7974_v55 = vld [vmem:[#allocation40_spill] sm:$0xff] }
 0x175   :  { %4804 = vmatprep.subr.bf16.mxu1 %v6569_v9  ;;  %5033 = vmatprep.subr.bf16.mxu0 %v7883_v35  ;;  %v7947_v9 = vld [vmem:[#allocation87_spill] sm:$0xff] }
 0x176   :  { %v7948_v41 = vand.u32 4294901760, %v7947_v9  ;;  %v2237_v43 = vand.u32 4294901760, %v2236_v25  ;;  %v2243_v26 = vsub.f32 %v7953_v13, %v7954_v34  ;;  %v7975_v25 = vand.u32 4294901760, %v7974_v55  ;;  %v7986_v13 = vld [vmem:[#allocation70_spill] sm:$0xff]  ;;  %v7987_v34 = vld [vmem:[#allocation101_spill] sm:$0xff] }
 0x178   :  { %4806 = vmatpush3.bf16.msra.mxu1 %v6578_v20  ;;  %5035 = vmatpush3.bf16.msra.mxu0 %v6689_v16  ;;  %v2117_v20 = vsub.f32 %v7947_v9, %v7948_v41  ;;  %v4819_v56 = vpack.c.bf16 %v2237_v43, %v2230_v23  ;;  %v2244_v8 = vand.u32 4294901760, %v2243_v26  ;;  %v3539_v45 = vpop.f32.mrb[4].mxu1  ;;  %v7976_v9 = vld [vmem:[#allocation45_spill] sm:$0xff]  ;;  %v7977_v41 = vld [vmem:[#allocation46_spill] sm:$0xff]  ;;  %v7985_v43 = vld [vmem:[#allocation100_spill] sm:$0xff] }
 0x179   :  { %4808 = vmatprep.subr.bf16.mxu1 %v6592_v60  ;;  %5036 = vmatprep.subr.bf16.mxu0 %v7883_v35  ;;  %v2124_v60 = vsub.f32 %v7949_v12, %v7950_v14  ;;  %v3540_v42 = vpop.f32.mrb[5].mxu1  ;;  %v3819_v48 = vpop.f32.mrb[4].mxu0  ;;  %v7980_v12 = vld [vmem:[#allocation57_spill] sm:$0xff] }
 0x17a   :  { %v2118_v59 = vand.u32 4294901760, %v2117_v20  ;;  %v3541_v49 = vadd.f32 %v3540_v42, %v3539_v45  ;;  %v3820_v15 = vpop.f32.mrb[5].mxu0  ;;  %v7978_v20 = vld [vmem:[#allocation50_spill] sm:$0xff]  ;;  %v7981_v14 = vld [vmem:[#allocation77_spill] sm:$0xff] }
 0x17b   :  { %v2125_v58 = vand.u32 4294901760, %v2124_v60  ;;  %v7020_v50 = vadd.f32 %v3820_v15, %v3819_v48  ;;  %v7982_v60 = vld [vmem:[#allocation82_spill] sm:$0xff]  ;;  %v7984_v23 = vld [vmem:[#allocation81_spill] sm:$0xff] }
 0x17c   :  { %4810 = vmatpush3.bf16.msra.mxu1 %v6600_v53  ;;  %5038 = vmatpush3.bf16.msra.mxu0 %v7951_v7  ;;  %v7956_v53 = vand.u32 4294901760, %v7955_v61  ;;  %v672_v19 = vadd.f32 %v3541_v49, %v6958_v33  ;;  %v7971_v33 = vand.u32 4294901760, %v6794_v27  ;;  %v7979_v27 = vld [vmem:[#allocation62_spill] sm:$0xff] }
 0x17d   :  { %4812 = vmatprep.subr.bf16.mxu1 %v7952_v46  ;;  %5039 = vmatprep.subr.bf16.mxu0 %v7883_v35  ;;  %v4821_v57 = vpack.c.bf16 %v2125_v58, %v2118_v59  ;;  %v7983_v46 = vld [vmem:[#allocation58_spill] sm:$0xff]  ;;  %v7989_v58 = vld [vmem:[#allocation13_spill] sm:$0xff] }
 0x17e   :  { %v2250_v38 = vsub.f32 %v7955_v61, %v7956_v53 }
 0x180   :  { %4814 = vmatpush3.bf16.msra.mxu1 %v7957_v30  ;;  %5041 = vmatpush3.bf16.msra.mxu0 %v7962_v36  ;;  %v2251_v6 = vand.u32 4294901760, %v2250_v38  ;;  %v7988_v30 = vld [vmem:[#allocation103_spill] sm:$0xff] }
 0x181   :  { %4816 = vmatprep.subr.bf16.mxu1 %v7963_v0  ;;  %5042 = vmatprep.subr.bf16.mxu0 %v7883_v35  ;;  %v7994_v0 = vld [vmem:[#allocation17_spill] sm:$0xff] }
 0x182   :  { %v4823_v37 = vpack.c.bf16 %v2251_v6, %v2244_v8  ;;  %v7996_v8 = vld [vmem:[#allocation102_spill] sm:$0xff] }
 0x183   :  { %v7997_v6 = vand.u32 4294901760, %v7996_v8 }
 0x184   :  { %4818 = vmatpush3.bf16.msra.mxu1 %v7964_v3  ;;  %5044 = vmatpush3.bf16.msra.mxu0 %v7965_v21 }
 0x185   :  { %4820 = vmatprep.subr.bf16.mxu1 %v4819_v56  ;;  %5045 = vmatprep.subr.bf16.mxu0 %v7883_v35  ;;  %v7995_v56 = vld [vmem:[#allocation21_spill] sm:$0xff] }
 0x188   :  { %4822 = vmatpush3.bf16.msra.mxu1 %v4821_v57  ;;  %5047 = vmatpush3.bf16.msra.mxu0 %v7966_v52 }
 0x189   :  { %4824 = vmatprep.subr.bf16.mxu1 %v4823_v37  ;;  %5048 = vmatprep.subr.bf16.mxu0 %v7883_v35 }
 0x18c   :  { %4826 = vmatpush3.bf16.msra.mxu1 %v4825_v54  ;;  %5050 = vmatpush3.bf16.msra.mxu0 %v7967_v62 }
 0x18d   :  { %4860 = vmatprep.subr.bf16.mxu1 %v7968_v18  ;;  %5051 = vmatprep.subr.bf16.mxu0 %v7883_v35 }
 0x18f   :  { %2256 = vmatmul.mubr.f32.vlgmr.msra.gmra.mrb[18].mxu1 %v7969_v24  ;;  %4307 = vmatmul.mubr.f32.vlgmr.msra.gmra.mrb[12].mxu0 %v7971_v33 }
 0x190   :  { %4862 = vmatpush3.bf16.msra.mxu1 %v7970_v4  ;;  %5053 = vmatpush3.bf16.msra.mxu0 %v7972_v44 }
 0x191   :  { %4864 = vmatprep.subr.bf16.mxu1 %v7973_v39  ;;  %5054 = vmatprep.subr.bf16.mxu0 %v7883_v35 }
 0x192   :  { %2498 = vmatprep.mubr.f32.mxu1 %v7975_v25  ;;  %4341 = vmatprep.mubr.msk.f32.mxu0 %vm5196_vm0, %v7922_v32 }
 0x194   :  { %4866 = vmatpush3.bf16.msra.mxu1 %v7976_v9  ;;  %5056 = vmatpush3.bf16.msra.mxu0 %v7977_v41 }
 0x195   :  { %4868 = vmatprep.subr.bf16.mxu1 %v7978_v20  ;;  %5057 = vmatprep.subr.bf16.mxu0 %v7883_v35 }
 0x198   :  { %4870 = vmatpush3.bf16.msra.mxu1 %v7979_v27  ;;  %5059 = vmatpush3.bf16.msra.mxu0 %v7980_v12 }
 0x199   :  { %4872 = vmatprep.subr.bf16.mxu1 %v7981_v14  ;;  %5060 = vmatprep.subr.bf16.mxu0 %v7883_v35 }
 0x19c   :  { %4874 = vmatpush3.bf16.msra.mxu1 %v7982_v60  ;;  %5062 = vmatpush3.bf16.msra.mxu0 %v7983_v46 }
 0x19d   :  { %4876 = vmatprep.subr.bf16.mxu1 %v7984_v23  ;;  %5063 = vmatprep.subr.bf16.mxu0 %v7883_v35 }
 0x1a0   :  { %4878 = vmatpush3.bf16.msra.mxu1 %v7985_v43  ;;  %5065 = vmatpush3.bf16.msra.mxu0 %v7986_v13  ;;  %v3889_v53 = vpop.f32.mrb[6].mxu0 }
 0x1a1   :  { %4880 = vmatprep.subr.bf16.mxu1 %v7987_v34  ;;  %5066 = vmatprep.subr.bf16.mxu0 %v7883_v35  ;;  %v3890_v59 = vpop.f32.mrb[7].mxu0 }
 0x1a2   :  { %v3574_v26 = vpop.f32.mrb[6].mxu1  ;;  %v7059_v28 = vadd.f32 %v3890_v59, %v3889_v53 }
 0x1a3   :  { %v3575_v61 = vpop.f32.mrb[7].mxu1 }
 0x1a4   :  { %v3576_v38 = vadd.f32 %v3575_v61, %v3574_v26  ;;  %4882 = vmatpush3.bf16.msra.mxu1 %v7988_v30  ;;  %5068 = vmatpush3.bf16.msra.mxu0 %v7989_v58 }
 0x1a5   :  { %4884 = vmatprep.subr.bf16.mxu1 %v7990_v63  ;;  %5069 = vmatprep.subr.bf16.mxu0 %v7883_v35 }
 0x1a6   :  { %v780_v47 = vadd.f32 %v3576_v38, %v672_v19 }
 0x1a8   :  { %4886 = vmatpush3.bf16.msra.mxu1 %v7991_v1  ;;  %5071 = vmatpush3.bf16.msra.mxu0 %v7992_v31 }
 0x1a9   :  { %4888 = vmatprep.subr.bf16.mxu1 %v7993_v17  ;;  %5072 = vmatprep.subr.bf16.mxu0 %v7883_v35 }
 0x1ac   :  { %4890 = vmatpush3.bf16.msra.mxu1 %v7994_v0  ;;  %5074 = vmatpush3.bf16.msra.mxu0 %v7995_v56 }
 0x1ad   :  { %4924 = vmatprep.subr.bf16.mxu1 %v7968_v18  ;;  %5075 = vmatprep.subr.bf16.mxu0 %v7883_v35 }
 0x1af   :  { %2502 = vmatmul.mubr.f32.vlgmr.msra.gmra.mrb[20].mxu1 %v7997_v6  ;;  %4342 = vmatmul.mubr.f32.vlgmr.msra.gmra.mrb[12].mxu0 %v6768_v51 }
 0x1b0   :  { %4926 = vmatpush3.bf16.msra.mxu1 %v7970_v4  ;;  %5077 = vmatpush3.bf16.msra.mxu0 %v6653_v11 }
 0x1b1   :  { %4928 = vmatprep.subr.bf16.mxu1 %v7973_v39  ;;  %5078 = vmatprep.subr.bf16.mxu0 %v7883_v35 }
 0x1b2   :  { %2772 = vmatprep.mubr.f32.mxu1 %v7944_v22  ;;  %4376 = vmatprep.mubr.msk.f32.mxu0 %vm5196_vm0, %v7922_v32 }
 0x1b4   :  { %4930 = vmatpush3.bf16.msra.mxu1 %v7976_v9  ;;  %5080 = vmatpush3.bf16.msra.mxu0 %v6664_v5 }
 0x1b5   :  { %4932 = vmatprep.subr.bf16.mxu1 %v7978_v20  ;;  %5081 = vmatprep.subr.bf16.mxu0 %v7883_v35 }
 0x1b8   :  { %4934 = vmatpush3.bf16.msra.mxu1 %v7979_v27  ;;  %5083 = vmatpush3.bf16.msra.mxu0 %v6689_v16 }
 0x1b9   :  { %4936 = vmatprep.subr.bf16.mxu1 %v7981_v14  ;;  %5084 = vmatprep.subr.bf16.mxu0 %v7883_v35 }
 0x1bc   :  { %4938 = vmatpush3.bf16.msra.mxu1 %v7982_v60  ;;  %5086 = vmatpush3.bf16.msra.mxu0 %v7951_v7 }
 0x1bd   :  { %4940 = vmatprep.subr.bf16.mxu1 %v7984_v23  ;;  %5087 = vmatprep.subr.bf16.mxu0 %v7883_v35 }
 0x1c0   :  { %4942 = vmatpush3.bf16.msra.mxu1 %v7985_v43  ;;  %5089 = vmatpush3.bf16.msra.mxu0 %v7962_v36 }
 0x1c1   :  { %4944 = vmatprep.subr.bf16.mxu1 %v7987_v34  ;;  %5090 = vmatprep.subr.bf16.mxu0 %v7883_v35 }
 0x1c2   :  { %v3609_v11 = vpop.f32.mrb[8].mxu1  ;;  %v3959_v16 = vpop.f32.mrb[8].mxu0 }
 0x1c3   :  { %v3610_v5 = vpop.f32.mrb[9].mxu1  ;;  %v3960_v22 = vpop.f32.mrb[9].mxu0 }
 0x1c4   :  { %v3611_v32 = vadd.f32 %v3610_v5, %v3609_v11  ;;  %4946 = vmatpush3.bf16.msra.mxu1 %v7988_v30  ;;  %5092 = vmatpush3.bf16.msra.mxu0 %v7965_v21  ;;  %v3961_v7 = vadd.f32 %v3960_v22, %v3959_v16 }
 0x1c5   :  { %4948 = vmatprep.subr.bf16.mxu1 %v7990_v63  ;;  %5093 = vmatprep.subr.bf16.mxu0 %v7883_v35 }
 0x1c6   :  { %v948_v45 = vadd.f32 %v3611_v32, %v780_v47 }
 0x1c8   :  { %4950 = vmatpush3.bf16.msra.mxu1 %v7991_v1  ;;  %5095 = vmatpush3.bf16.msra.mxu0 %v7966_v52 }
 0x1c9   :  { %4952 = vmatprep.subr.bf16.mxu1 %v7993_v17  ;;  %5096 = vmatprep.subr.bf16.mxu0 %v7883_v35 }
 0x1cc   :  { %4954 = vmatpush3.bf16.msra.mxu1 %v7994_v0  ;;  %5098 = vmatpush3.bf16.msra.mxu0 %v7967_v62 }
 0x1cf   :  { %2774 = vmatmul.mubr.f32.vlgmr.msra.gmra.mrb[22].mxu1 %v7969_v24  ;;  %4377 = vmatmul.mubr.f32.vlgmr.msra.gmra.mrb[12].mxu0 %v6768_v51 }
 0x1e2   :  { %v3644_v36 = vpop.f32.mrb[10].mxu1  ;;  %v4029_v48 = vpop.f32.mrb[10].mxu0 }
 0x1e3   :  { %v3645_v42 = vpop.f32.mrb[11].mxu1  ;;  %v4030_v3 = vpop.f32.mrb[11].mxu0 }
 0x1e4   :  { %v3646_v49 = vadd.f32 %v3645_v42, %v3644_v36  ;;  %v4031_v15 = vadd.f32 %v4030_v3, %v4029_v48 }
 0x1e6   :  { %v1052_v57 = vadd.f32 %v3646_v49, %v948_v45 }
 0x1e8   :  { %v1164_v2 = vadd.f32 %v6907_v40, %v1052_v57 }
 0x202   :  { %v3714_v29 = vpop.f32.mrb[12].mxu1 }
 0x203   :  { %v3715_v21 = vpop.f32.mrb[13].mxu1 }
 0x204   :  { %v3716_v35 = vadd.f32 %v3715_v21, %v3714_v29 }
 0x206   :  { %v1396_v37 = vadd.f32 %v3716_v35, %v1164_v2 }
 0x208   :  { %v1534_v19 = vadd.f32 %v6954_v10, %v1396_v37 }
 0x222   :  { %v3784_v54 = vpop.f32.mrb[14].mxu1 }
 0x223   :  { %v3785_v52 = vpop.f32.mrb[15].mxu1 }
 0x224   :  { %v3786_v62 = vadd.f32 %v3785_v52, %v3784_v54 }
 0x226   :  { %v1642_v18 = vadd.f32 %v3786_v62, %v1534_v19 }
 0x228   :  { %v1810_v51 = vadd.f32 %v7020_v50, %v1642_v18 }
 0x242   :  { %v3854_v24 = vpop.f32.mrb[16].mxu1 }
 0x243   :  { %v3855_v4 = vpop.f32.mrb[17].mxu1 }
 0x244   :  { %v3856_v33 = vadd.f32 %v3855_v4, %v3854_v24 }
 0x246   :  { %v1914_v44 = vadd.f32 %v3856_v33, %v1810_v51 }
 0x248   :  { %v2026_v39 = vadd.f32 %v7059_v28, %v1914_v44 }
 0x262   :  { %v3924_v55 = vpop.f32.mrb[18].mxu1 }
 0x263   :  { %v3925_v40 = vpop.f32.mrb[19].mxu1 }
 0x264   :  { %v3926_v25 = vadd.f32 %v3925_v40, %v3924_v55 }
 0x266   :  { %v2258_v9 = vadd.f32 %v3926_v25, %v2026_v39 }
 0x268   :  { %v2396_v41 = vadd.f32 %v3961_v7, %v2258_v9 }
 0x282   :  { %v3994_v20 = vpop.f32.mrb[20].mxu1 }
 0x283   :  { %v3995_v27 = vpop.f32.mrb[21].mxu1 }
 0x284   :  { %v3996_v10 = vadd.f32 %v3995_v27, %v3994_v20 }
 0x286   :  { %v2504_v12 = vadd.f32 %v3996_v10, %v2396_v41 }
 0x288   :  { %v2672_v14 = vadd.f32 %v4031_v15, %v2504_v12 }
 0x2a2   :  { %v4064_v60 = vpop.f32.mrb[22].mxu1  ;;  %v3416_v46 = vpop.f32.mrb[12].mxu0 }
 0x2a3   :  { %v4065_v23 = vpop.f32.mrb[23].mxu1  ;;  %v4378_v43 = vpop.f32.mrb[13].mxu0 }
 0x2a4   :  { %v4066_v50 = vadd.f32 %v4065_v23, %v4064_v60 }
 0x2a6   :  { %v2776_v13 = vadd.f32 %v4066_v50, %v2672_v14 }
 0x2a8   :  { %v5099_v34 = vadd.f32 %v3416_v46, %v2776_v13 }
 0x2aa   :  { %3420 = vst [vmem:[#allocation8] sm:$0x1] %v5099_v34 }
 0x2ab   :  { %5174 = shalt.err (!%p5171_p6)
}
 0x2ac   :  { %s5175_s17 = scalar_lea.hbm %s7127_s3, 16 }
 0x2ad   :  { %p5176_p7 = scmp.ne.s32.totalorder %s7127_s3, %s5175_s17  ;;  %p5179_p8 = scmp.lt.u32.totalorder %s5175_s17, %s7127_s3 }
 0x2af   :  { %p5181_p9 = pnand %p5179_p8, %p5176_p7 }
 0x2b1   :  { %5184 = shalt.err (!%p5181_p9)
}
 0x2b2   :  { %3430 = dma.vmem_to_hbm [thread:$0]  %s3428_s12, 16, %s7127_s3, [#allocation5]  }
 0x2b3   :  { %5189 = dma.done.wait [#allocation5], 16  }
 0x2b4   :  { %5190 = vsyncadd [#allocation5], 4294967280 }
 0x2b5   :  { %3434 = vsyncpa [#allocation4], 1 }
 0x2b6   :  { %3435 = vsyncpa [#allocation7], 1 }
 0x2b7   :  { %3436 = vsyncpa [#allocation5], 1 }

</bundles_post_ra>
